<compile_context>
chip_gen: v6e
topology: v6e:2x2x1
jax: 0.10.0
libtpu: 0.0.40
codegen_flags: <defaults>
</compile_context>

<pallas_src>
import functools

import jax
import jax.numpy as jnp
from jax.experimental import pallas as pl
from jax.experimental.pallas import tpu as pltpu


# ----------------------------- fused LSTM kernel -----------------------------
def _lstm_kernel(x_ref, len_ref, tlast_ref, *refs,
                 num_layers, seq_len, batch, units):
    """Whole multi-layer LSTM recurrence in one invocation (all VMEM-resident).

    x_ref    : (T*B, E)  bf16, time-major flattened input (row t*B + b <-> (b, t))
    len_ref  : (B, 1)    int32 valid lengths (0 for padded batch rows)
    tlast_ref: (1,)      int32 SMEM scalar, max(lengths) - 1
    refs = (w_ih_0, w_hh_0, b_0, ..., w_ih_{L-1}, w_hh_{L-1}, b_{L-1},
            out_ref, seq_ref, xproj_ref)
    """
    U, B, T = units, batch, seq_len
    w_refs = refs[:3 * num_layers]
    out_ref = refs[3 * num_layers]
    seq_ref = refs[3 * num_layers + 1]      # (T*B, U)  bf16 inter-layer scratch
    xproj_ref = refs[3 * num_layers + 2]    # (T*B, 4U) f32 hoisted input projection

    # ---- hoisted once, reused across all layers / unrolled steps ----------------
    lengths_bU = jnp.broadcast_to(len_ref[...], (B, U))           # (B, U) int32
    tlast_bU = jnp.full((B, U), tlast_ref[0], dtype=jnp.int32)    # (B, U) int32
    masks = [lengths_bU > t for t in range(T)]                    # per-t validity, bool

    out_acc = jnp.zeros((B, U), jnp.float32)

    for layer in range(num_layers):                               # static L: unrolled
        w_ih = w_refs[3 * layer][...]                             # (E_l, 4U) bf16
        w_hh = w_refs[3 * layer + 1][...]                         # (U,   4U) bf16
        bias = w_refs[3 * layer + 2][...]                         # (1,   4U) f32

        # Input projection + bias hoisted out of the serial recurrence: one big MXU
        # matmul (M = T*B rows) instead of T tiny ones on the critical h->h path.
        layer_in = x_ref[...] if layer == 0 else seq_ref[...]
        xproj_ref[...] = (
            jnp.dot(layer_in, w_ih, preferred_element_type=jnp.float32) + bias)

        h = jnp.zeros((B, U), jnp.float32)
        c = jnp.zeros((B, U), jnp.float32)
        last_layer = layer == num_layers - 1

        # TODO(synk): for seq_len >> 32, switch this unrolled loop to lax.fori_loop
        #             carrying (h, c, out_acc) to bound code size / vreg live ranges.
        for t in range(T):                                        # static T: unrolled
            m = masks[t]
            gates = (xproj_ref[pl.ds(t * B, B), :]
                     + jnp.dot(h.astype(jnp.bfloat16), w_hh,
                               preferred_element_type=jnp.float32))

            # Full-vreg activations: sigmoid(x) = 0.5*tanh(0.5*x) + 0.5 over the whole
            # (B, 4U) gates vreg plus one full-vreg tanh => 2 EUP pushes per step.
            sig = jnp.tanh(gates * 0.5) * 0.5 + 0.5
            tnh = jnp.tanh(gates)
            i_g = sig[:, 0 * U:1 * U]
            f_g = sig[:, 1 * U:2 * U]
            g_g = tnh[:, 2 * U:3 * U]
            o_g = sig[:, 3 * U:4 * U]

            c_new = f_g * c + i_g * g_g
            h_new = o_g * jnp.tanh(c_new)

            # packed-sequence semantics: state freezes for t >= lengths[b]
            c = jnp.where(m, c_new, c)
            h = jnp.where(m, h_new, h)

            if last_layer:
                # out = output_unpacked[:, -1, :] (zeros where t_last >= lengths[b]).
                # Accumulated in vregs under a select: no per-step stores, no dynamic
                # gather, and well-defined (stays 0) if all lengths are 0 (t_last=-1).
                out_acc = jnp.where(jnp.logical_and(m, tlast_bU == t), h, out_acc)
            else:
                # pad_packed_sequence zeros padded positions of the inter-layer input
                seq_ref[pl.ds(t * B, B), :] = jnp.where(m, h, 0.0).astype(jnp.bfloat16)

    out_ref[...] = out_acc


# ----------------------------- host-side wrapper ------------------------------
def lstm_forward(layers, embedded, lengths, units):
    """layers: list of {'w_ih': (E_l,4U) bf16, 'w_hh': (U,4U) bf16, 'bias': (1,4U) f32}."""
    B, T, E = embedded.shape
    L, U = len(layers), units
    B_pad = ((B + 7) // 8) * 8                         # 8-row sublane minimum

    # pad batch (padded rows get length 0 -> fully masked), time-major flatten
    x = jnp.zeros((B_pad, T, E), jnp.bfloat16).at[:B].set(embedded.astype(jnp.bfloat16))
    x2d = jnp.transpose(x, (1, 0, 2)).reshape(T * B_pad, E)
    lens = jnp.zeros((B_pad, 1), jnp.int32).at[:B, 0].set(lengths.astype(jnp.int32))
    t_last = (jnp.max(lengths).astype(jnp.int32) - 1).reshape(1)

    vmem = pl.BlockSpec(memory_space=pltpu.MemorySpace.VMEM)
    smem = pl.BlockSpec(memory_space=pltpu.MemorySpace.SMEM)

    flat_weights, in_specs = [], [vmem, vmem, smem]
    for lyr in layers:
        flat_weights += [lyr["w_ih"], lyr["w_hh"], lyr["bias"]]
        in_specs += [vmem, vmem, vmem]

    kernel = functools.partial(
        _lstm_kernel, num_layers=L, seq_len=T, batch=B_pad, units=U)

    out_pad = pl.pallas_call(
        kernel,
        out_shape=jax.ShapeDtypeStruct((B_pad, U), jnp.float32),
        in_specs=in_specs,
        out_specs=vmem,
        scratch_shapes=[
            pltpu.VMEM((T * B_pad, U), jnp.bfloat16),       # inter-layer sequence
            pltpu.VMEM((T * B_pad, 4 * U), jnp.float32),    # hoisted input projection
        ],
        compiler_params=pltpu.CompilerParams(vmem_limit_bytes=32 * 1024 * 1024),
    )(x2d, lens, t_last, *flat_weights)
    # TODO(synk): on v7x the (padded) batch could be split across the 2 TensorCores
    #             with a size-2 "parallel" grid axis; single-core on v5e/v6e so omitted.
    # TODO(synk): for large T, tile the time axis with a grid + BlockSpec pipelining,
    #             carrying h/c in persistent VMEM scratch across an "arbitrary" axis.
    return out_pad[:B]


# ----------------------------- parameter init (deterministic) -----------------
def init_params(key, embed_dim, units, num_layers):
    # nn.LSTM init: U(-k, k), k = 1/sqrt(hidden); gate order i, f, g, o.
    # Weights kept in bf16 (MXU-native operands); biases pre-fused (b_ih+b_hh) in f32.
    k = 1.0 / (units ** 0.5)
    layers = []
    for l in range(num_layers):
        in_dim = embed_dim if l == 0 else units
        key, k1, k2, k3, k4 = jax.random.split(key, 5)
        w_ih = jax.random.uniform(k1, (in_dim, 4 * units), jnp.float32, -k, k)
        w_hh = jax.random.uniform(k2, (units, 4 * units), jnp.float32, -k, k)
        b_ih = jax.random.uniform(k3, (4 * units,), jnp.float32, -k, k)
        b_hh = jax.random.uniform(k4, (4 * units,), jnp.float32, -k, k)
        layers.append({
            "w_ih": w_ih.astype(jnp.bfloat16),
            "w_hh": w_hh.astype(jnp.bfloat16),
            "bias": (b_ih + b_hh).reshape(1, 4 * units),
        })
    return layers
# TODO(synk): bidirectional=True path not implemented (module default is False and the
#             provided forward never enables it).


# ----------------------------- pure-JAX reference (for correctness) -----------
def lstm_reference(layers, embedded, lengths, units):
    B, T, _ = embedded.shape
    U = units
    mask = jnp.arange(T)[None, :] < lengths[:, None]            # (B, T) bool
    layer_in = embedded.astype(jnp.float32)
    for lyr in layers:
        h = jnp.zeros((B, U), jnp.float32)
        c = jnp.zeros((B, U), jnp.float32)
        outs = []
        for t in range(T):
            x_t = layer_in[:, t, :].astype(jnp.bfloat16)        # same operand rounding
            gates = (jnp.dot(x_t, lyr["w_ih"], preferred_element_type=jnp.float32)
                     + jnp.dot(h.astype(jnp.bfloat16), lyr["w_hh"],
                               preferred_element_type=jnp.float32)
                     + lyr["bias"])
            i_g = jax.nn.sigmoid(gates[:, 0 * U:1 * U])
            f_g = jax.nn.sigmoid(gates[:, 1 * U:2 * U])
            g_g = jnp.tanh(gates[:, 2 * U:3 * U])
            o_g = jax.nn.sigmoid(gates[:, 3 * U:4 * U])
            c_new = f_g * c + i_g * g_g
            h_new = o_g * jnp.tanh(c_new)
            m = mask[:, t:t + 1]
            c = jnp.where(m, c_new, c)
            h = jnp.where(m, h_new, h)
            outs.append(jnp.where(m, h, 0.0))
        layer_in = jnp.stack(outs, axis=1)
    t_last = jnp.max(lengths) - 1
    return layer_in[:, t_last, :]


# ----------------------------- main -------------------------------------------
if __name__ == "__main__":
    B, T, E, U, L = 4, 8, 32, 32, 2    # batch, seq, embedding_dim, lstm_units, lstm_layers
    key = jax.random.PRNGKey(0)
    pkey, xkey = jax.random.split(key)

    layers = init_params(pkey, E, U, L)
    embedded = jax.random.normal(xkey, (B, T, E), jnp.float32)
    # pack_padded_sequence expects lengths sorted descending
    lengths = jnp.array([8, 7, 5, 3], jnp.int32)

    out = lstm_forward(layers, embedded, lengths, U)
    out = jax.block_until_ready(out)

    ref = lstm_reference(layers, embedded, lengths, U)

    assert out.shape == (B, U) and out.dtype == jnp.float32
    assert bool(jnp.all(jnp.isfinite(out)))
    max_err = float(jnp.max(jnp.abs(out - ref)))
    # kernel and reference use identical bf16 matmul operands with f32 accumulation, so
    # only f32 accumulation-order / sigmoid-impl differences remain -> tight tolerance.
    assert max_err < 1e-3, f"mismatch vs pure-JAX reference: {max_err}"
    print("KERNEL_OK")
</pallas_src>

<mosaic_0001>
module attributes {stable_mosaic.version = 11 : i64} {
  func.func @_lstm_kernel(%arg0: memref<64x32xbf16, #tpu.memory_space<vmem>>, %arg1: memref<8x1xi32, #tpu.memory_space<vmem>>, %arg2: memref<1xi32, #tpu.memory_space<smem>>, %arg3: memref<32x128xbf16, #tpu.memory_space<vmem>>, %arg4: memref<32x128xbf16, #tpu.memory_space<vmem>>, %arg5: memref<1x128xf32, #tpu.memory_space<vmem>>, %arg6: memref<32x128xbf16, #tpu.memory_space<vmem>>, %arg7: memref<32x128xbf16, #tpu.memory_space<vmem>>, %arg8: memref<1x128xf32, #tpu.memory_space<vmem>>, %arg9: memref<8x32xf32, #tpu.memory_space<vmem>>, %arg10: memref<64x32xbf16, #tpu.memory_space<vmem>>, %arg11: memref<64x128xf32, #tpu.memory_space<vmem>>) attributes {dimension_semantics = [], scalar_prefetch = 0 : i64, scratch_operands = 2 : i64, tpu.core_type = #tpu.core_type<tc>} {
    %c0 = arith.constant 0 : index
    %c0_0 = arith.constant 0 : index
    %0 = vector.load %arg1[%c0, %c0_0] : memref<8x1xi32, #tpu.memory_space<vmem>>, vector<8x1xi32>
    %1 = vector.shape_cast %0 : vector<8x1xi32> to vector<8x1xi32>
    %2 = vector.broadcast %1 : vector<8x1xi32> to vector<8x32xi32>
    %c0_1 = arith.constant 0 : index
    %3 = memref.load %arg2[%c0_1] : memref<1xi32, #tpu.memory_space<smem>>
    %4 = vector.broadcast %3 : i32 to vector<8x32xi32>
    %c0_i32 = arith.constant 0 : i32
    %5 = vector.broadcast %c0_i32 : i32 to vector<8x32xi32>
    %6 = arith.cmpi sgt, %2, %5 : vector<8x32xi32>
    %c1_i32 = arith.constant 1 : i32
    %7 = vector.broadcast %c1_i32 : i32 to vector<8x32xi32>
    %8 = arith.cmpi sgt, %2, %7 : vector<8x32xi32>
    %c2_i32 = arith.constant 2 : i32
    %9 = vector.broadcast %c2_i32 : i32 to vector<8x32xi32>
    %10 = arith.cmpi sgt, %2, %9 : vector<8x32xi32>
    %c3_i32 = arith.constant 3 : i32
    %11 = vector.broadcast %c3_i32 : i32 to vector<8x32xi32>
    %12 = arith.cmpi sgt, %2, %11 : vector<8x32xi32>
    %c4_i32 = arith.constant 4 : i32
    %13 = vector.broadcast %c4_i32 : i32 to vector<8x32xi32>
    %14 = arith.cmpi sgt, %2, %13 : vector<8x32xi32>
    %c5_i32 = arith.constant 5 : i32
    %15 = vector.broadcast %c5_i32 : i32 to vector<8x32xi32>
    %16 = arith.cmpi sgt, %2, %15 : vector<8x32xi32>
    %c6_i32 = arith.constant 6 : i32
    %17 = vector.broadcast %c6_i32 : i32 to vector<8x32xi32>
    %18 = arith.cmpi sgt, %2, %17 : vector<8x32xi32>
    %c7_i32 = arith.constant 7 : i32
    %19 = vector.broadcast %c7_i32 : i32 to vector<8x32xi32>
    %20 = arith.cmpi sgt, %2, %19 : vector<8x32xi32>
    %cst = arith.constant 0.000000e+00 : f32
    %21 = vector.broadcast %cst : f32 to vector<8x32xf32>
    %c0_2 = arith.constant 0 : index
    %c0_3 = arith.constant 0 : index
    %22 = vector.load %arg3[%c0_2, %c0_3] : memref<32x128xbf16, #tpu.memory_space<vmem>>, vector<32x128xbf16>
    %c0_4 = arith.constant 0 : index
    %c0_5 = arith.constant 0 : index
    %23 = vector.load %arg4[%c0_4, %c0_5] : memref<32x128xbf16, #tpu.memory_space<vmem>>, vector<32x128xbf16>
    %c0_6 = arith.constant 0 : index
    %c0_7 = arith.constant 0 : index
    %24 = vector.load %arg5[%c0_6, %c0_7] : memref<1x128xf32, #tpu.memory_space<vmem>>, vector<1x128xf32>
    %c0_8 = arith.constant 0 : index
    %c0_9 = arith.constant 0 : index
    %25 = vector.load %arg0[%c0_8, %c0_9] : memref<64x32xbf16, #tpu.memory_space<vmem>>, vector<64x32xbf16>
    %cst_10 = arith.constant dense<0.000000e+00> : vector<64x128xf32>
    %26 = tpu.matmul %25, %22, %cst_10 {dimension_numbers = #tpu.dot_dimension_numbers<[1], [0], [0], [1], [0, 0, 1, 1], [], []>} : vector<64x32xbf16>, vector<32x128xbf16>, vector<64x128xf32> -> vector<64x128xf32>
    %27 = vector.broadcast %24 : vector<1x128xf32> to vector<64x128xf32>
    %28 = arith.addf %26, %27 : vector<64x128xf32>
    %c0_11 = arith.constant 0 : index
    %c0_12 = arith.constant 0 : index
    %29 = vector.load %arg11[%c0_11, %c0_12] : memref<64x128xf32, #tpu.memory_space<vmem>>, vector<64x128xf32>
    tpu.vector_store %arg11[%c0_11, %c0_12], %28 {strides = array<i32>} : memref<64x128xf32, #tpu.memory_space<vmem>>, vector<64x128xf32>,
    %cst_13 = arith.constant 0.000000e+00 : f32
    %30 = vector.broadcast %cst_13 : f32 to vector<8x32xf32>
    %cst_14 = arith.constant 0.000000e+00 : f32
    %31 = vector.broadcast %cst_14 : f32 to vector<8x32xf32>
    %c0_15 = arith.constant 0 : index
    %c0_16 = arith.constant 0 : index
    %32 = vector.load %arg11[%c0_15, %c0_16] : memref<64x128xf32, #tpu.memory_space<vmem>>, vector<8x128xf32>
    %33 = arith.truncf %30 : vector<8x32xf32> to vector<8x32xbf16>
    %cst_17 = arith.constant dense<0.000000e+00> : vector<8x128xf32>
    %34 = tpu.matmul %33, %23, %cst_17 {dimension_numbers = #tpu.dot_dimension_numbers<[1], [0], [0], [1], [0, 0, 1, 1], [], []>} : vector<8x32xbf16>, vector<32x128xbf16>, vector<8x128xf32> -> vector<8x128xf32>
    %35 = arith.addf %32, %34 : vector<8x128xf32>
    %cst_18 = arith.constant 5.000000e-01 : f32
    %36 = vector.broadcast %cst_18 : f32 to vector<8x128xf32>
    %37 = arith.mulf %35, %36 : vector<8x128xf32>
    %38 = math.tanh %37 : vector<8x128xf32>
    %cst_19 = arith.constant 5.000000e-01 : f32
    %39 = vector.broadcast %cst_19 : f32 to vector<8x128xf32>
    %40 = arith.mulf %38, %39 : vector<8x128xf32>
    %cst_20 = arith.constant 5.000000e-01 : f32
    %41 = vector.broadcast %cst_20 : f32 to vector<8x128xf32>
    %42 = arith.addf %40, %41 : vector<8x128xf32>
    %43 = math.tanh %35 : vector<8x128xf32>
    %44 = vector.extract_strided_slice %42 {offsets = [0, 0], sizes = [8, 32], strides = [1, 1]} : vector<8x128xf32> to vector<8x32xf32>
    %45 = vector.extract_strided_slice %42 {offsets = [0, 32], sizes = [8, 32], strides = [1, 1]} : vector<8x128xf32> to vector<8x32xf32>
    %46 = vector.extract_strided_slice %43 {offsets = [0, 64], sizes = [8, 32], strides = [1, 1]} : vector<8x128xf32> to vector<8x32xf32>
    %47 = vector.extract_strided_slice %42 {offsets = [0, 96], sizes = [8, 32], strides = [1, 1]} : vector<8x128xf32> to vector<8x32xf32>
    %48 = arith.mulf %45, %31 : vector<8x32xf32>
    %49 = arith.mulf %44, %46 : vector<8x32xf32>
    %50 = arith.addf %48, %49 : vector<8x32xf32>
    %51 = math.tanh %50 : vector<8x32xf32>
    %52 = arith.mulf %47, %51 : vector<8x32xf32>
    %53 = arith.select %6, %50, %31 : vector<8x32xi1>, vector<8x32xf32>
    %54 = arith.select %6, %52, %30 : vector<8x32xi1>, vector<8x32xf32>
    %cst_21 = arith.constant 0.000000e+00 : f32
    %55 = vector.broadcast %cst_21 : f32 to vector<8x32xf32>
    %56 = arith.select %6, %54, %55 : vector<8x32xi1>, vector<8x32xf32>
    %57 = arith.truncf %56 : vector<8x32xf32> to vector<8x32xbf16>
    %c0_22 = arith.constant 0 : index
    %c0_23 = arith.constant 0 : index
    %58 = vector.load %arg10[%c0_22, %c0_23] : memref<64x32xbf16, #tpu.memory_space<vmem>>, vector<8x32xbf16>
    tpu.vector_store %arg10[%c0_22, %c0_23], %57 {strides = array<i32>} : memref<64x32xbf16, #tpu.memory_space<vmem>>, vector<8x32xbf16>,
    %c8 = arith.constant 8 : index
    %c0_24 = arith.constant 0 : index
    %59 = vector.load %arg11[%c8, %c0_24] : memref<64x128xf32, #tpu.memory_space<vmem>>, vector<8x128xf32>
    %60 = arith.truncf %54 : vector<8x32xf32> to vector<8x32xbf16>
    %cst_25 = arith.constant dense<0.000000e+00> : vector<8x128xf32>
    %61 = tpu.matmul %60, %23, %cst_25 {dimension_numbers = #tpu.dot_dimension_numbers<[1], [0], [0], [1], [0, 0, 1, 1], [], []>} : vector<8x32xbf16>, vector<32x128xbf16>, vector<8x128xf32> -> vector<8x128xf32>
    %62 = arith.addf %59, %61 : vector<8x128xf32>
    %cst_26 = arith.constant 5.000000e-01 : f32
    %63 = vector.broadcast %cst_26 : f32 to vector<8x128xf32>
    %64 = arith.mulf %62, %63 : vector<8x128xf32>
    %65 = math.tanh %64 : vector<8x128xf32>
    %cst_27 = arith.constant 5.000000e-01 : f32
    %66 = vector.broadcast %cst_27 : f32 to vector<8x128xf32>
    %67 = arith.mulf %65, %66 : vector<8x128xf32>
    %cst_28 = arith.constant 5.000000e-01 : f32
    %68 = vector.broadcast %cst_28 : f32 to vector<8x128xf32>
    %69 = arith.addf %67, %68 : vector<8x128xf32>
    %70 = math.tanh %62 : vector<8x128xf32>
    %71 = vector.extract_strided_slice %69 {offsets = [0, 0], sizes = [8, 32], strides = [1, 1]} : vector<8x128xf32> to vector<8x32xf32>
    %72 = vector.extract_strided_slice %69 {offsets = [0, 32], sizes = [8, 32], strides = [1, 1]} : vector<8x128xf32> to vector<8x32xf32>
    %73 = vector.extract_strided_slice %70 {offsets = [0, 64], sizes = [8, 32], strides = [1, 1]} : vector<8x128xf32> to vector<8x32xf32>
    %74 = vector.extract_strided_slice %69 {offsets = [0, 96], sizes = [8, 32], strides = [1, 1]} : vector<8x128xf32> to vector<8x32xf32>
    %75 = arith.mulf %72, %53 : vector<8x32xf32>
    %76 = arith.mulf %71, %73 : vector<8x32xf32>
    %77 = arith.addf %75, %76 : vector<8x32xf32>
    %78 = math.tanh %77 : vector<8x32xf32>
    %79 = arith.mulf %74, %78 : vector<8x32xf32>
    %80 = arith.select %8, %77, %53 : vector<8x32xi1>, vector<8x32xf32>
    %81 = arith.select %8, %79, %54 : vector<8x32xi1>, vector<8x32xf32>
    %cst_29 = arith.constant 0.000000e+00 : f32
    %82 = vector.broadcast %cst_29 : f32 to vector<8x32xf32>
    %83 = arith.select %8, %81, %82 : vector<8x32xi1>, vector<8x32xf32>
    %84 = arith.truncf %83 : vector<8x32xf32> to vector<8x32xbf16>
    %c8_30 = arith.constant 8 : index
    %c0_31 = arith.constant 0 : index
    %85 = vector.load %arg10[%c8_30, %c0_31] : memref<64x32xbf16, #tpu.memory_space<vmem>>, vector<8x32xbf16>
    tpu.vector_store %arg10[%c8_30, %c0_31], %84 {strides = array<i32>} : memref<64x32xbf16, #tpu.memory_space<vmem>>, vector<8x32xbf16>,
    %c16 = arith.constant 16 : index
    %c0_32 = arith.constant 0 : index
    %86 = vector.load %arg11[%c16, %c0_32] : memref<64x128xf32, #tpu.memory_space<vmem>>, vector<8x128xf32>
    %87 = arith.truncf %81 : vector<8x32xf32> to vector<8x32xbf16>
    %cst_33 = arith.constant dense<0.000000e+00> : vector<8x128xf32>
    %88 = tpu.matmul %87, %23, %cst_33 {dimension_numbers = #tpu.dot_dimension_numbers<[1], [0], [0], [1], [0, 0, 1, 1], [], []>} : vector<8x32xbf16>, vector<32x128xbf16>, vector<8x128xf32> -> vector<8x128xf32>
    %89 = arith.addf %86, %88 : vector<8x128xf32>
    %cst_34 = arith.constant 5.000000e-01 : f32
    %90 = vector.broadcast %cst_34 : f32 to vector<8x128xf32>
    %91 = arith.mulf %89, %90 : vector<8x128xf32>
    %92 = math.tanh %91 : vector<8x128xf32>
    %cst_35 = arith.constant 5.000000e-01 : f32
    %93 = vector.broadcast %cst_35 : f32 to vector<8x128xf32>
    %94 = arith.mulf %92, %93 : vector<8x128xf32>
    %cst_36 = arith.constant 5.000000e-01 : f32
    %95 = vector.broadcast %cst_36 : f32 to vector<8x128xf32>
    %96 = arith.addf %94, %95 : vector<8x128xf32>
    %97 = math.tanh %89 : vector<8x128xf32>
    %98 = vector.extract_strided_slice %96 {offsets = [0, 0], sizes = [8, 32], strides = [1, 1]} : vector<8x128xf32> to vector<8x32xf32>
    %99 = vector.extract_strided_slice %96 {offsets = [0, 32], sizes = [8, 32], strides = [1, 1]} : vector<8x128xf32> to vector<8x32xf32>
    %100 = vector.extract_strided_slice %97 {offsets = [0, 64], sizes = [8, 32], strides = [1, 1]} : vector<8x128xf32> to vector<8x32xf32>
    %101 = vector.extract_strided_slice %96 {offsets = [0, 96], sizes = [8, 32], strides = [1, 1]} : vector<8x128xf32> to vector<8x32xf32>
    %102 = arith.mulf %99, %80 : vector<8x32xf32>
    %103 = arith.mulf %98, %100 : vector<8x32xf32>
    %104 = arith.addf %102, %103 : vector<8x32xf32>
    %105 = math.tanh %104 : vector<8x32xf32>
    %106 = arith.mulf %101, %105 : vector<8x32xf32>
    %107 = arith.select %10, %104, %80 : vector<8x32xi1>, vector<8x32xf32>
    %108 = arith.select %10, %106, %81 : vector<8x32xi1>, vector<8x32xf32>
    %cst_37 = arith.constant 0.000000e+00 : f32
    %109 = vector.broadcast %cst_37 : f32 to vector<8x32xf32>
    %110 = arith.select %10, %108, %109 : vector<8x32xi1>, vector<8x32xf32>
    %111 = arith.truncf %110 : vector<8x32xf32> to vector<8x32xbf16>
    %c16_38 = arith.constant 16 : index
    %c0_39 = arith.constant 0 : index
    %112 = vector.load %arg10[%c16_38, %c0_39] : memref<64x32xbf16, #tpu.memory_space<vmem>>, vector<8x32xbf16>
    tpu.vector_store %arg10[%c16_38, %c0_39], %111 {strides = array<i32>} : memref<64x32xbf16, #tpu.memory_space<vmem>>, vector<8x32xbf16>,
    %c24 = arith.constant 24 : index
    %c0_40 = arith.constant 0 : index
    %113 = vector.load %arg11[%c24, %c0_40] : memref<64x128xf32, #tpu.memory_space<vmem>>, vector<8x128xf32>
    %114 = arith.truncf %108 : vector<8x32xf32> to vector<8x32xbf16>
    %cst_41 = arith.constant dense<0.000000e+00> : vector<8x128xf32>
    %115 = tpu.matmul %114, %23, %cst_41 {dimension_numbers = #tpu.dot_dimension_numbers<[1], [0], [0], [1], [0, 0, 1, 1], [], []>} : vector<8x32xbf16>, vector<32x128xbf16>, vector<8x128xf32> -> vector<8x128xf32>
    %116 = arith.addf %113, %115 : vector<8x128xf32>
    %cst_42 = arith.constant 5.000000e-01 : f32
    %117 = vector.broadcast %cst_42 : f32 to vector<8x128xf32>
    %118 = arith.mulf %116, %117 : vector<8x128xf32>
    %119 = math.tanh %118 : vector<8x128xf32>
    %cst_43 = arith.constant 5.000000e-01 : f32
    %120 = vector.broadcast %cst_43 : f32 to vector<8x128xf32>
    %121 = arith.mulf %119, %120 : vector<8x128xf32>
    %cst_44 = arith.constant 5.000000e-01 : f32
    %122 = vector.broadcast %cst_44 : f32 to vector<8x128xf32>
    %123 = arith.addf %121, %122 : vector<8x128xf32>
    %124 = math.tanh %116 : vector<8x128xf32>
    %125 = vector.extract_strided_slice %123 {offsets = [0, 0], sizes = [8, 32], strides = [1, 1]} : vector<8x128xf32> to vector<8x32xf32>
    %126 = vector.extract_strided_slice %123 {offsets = [0, 32], sizes = [8, 32], strides = [1, 1]} : vector<8x128xf32> to vector<8x32xf32>
    %127 = vector.extract_strided_slice %124 {offsets = [0, 64], sizes = [8, 32], strides = [1, 1]} : vector<8x128xf32> to vector<8x32xf32>
    %128 = vector.extract_strided_slice %123 {offsets = [0, 96], sizes = [8, 32], strides = [1, 1]} : vector<8x128xf32> to vector<8x32xf32>
    %129 = arith.mulf %126, %107 : vector<8x32xf32>
    %130 = arith.mulf %125, %127 : vector<8x32xf32>
    %131 = arith.addf %129, %130 : vector<8x32xf32>
    %132 = math.tanh %131 : vector<8x32xf32>
    %133 = arith.mulf %128, %132 : vector<8x32xf32>
    %134 = arith.select %12, %131, %107 : vector<8x32xi1>, vector<8x32xf32>
    %135 = arith.select %12, %133, %108 : vector<8x32xi1>, vector<8x32xf32>
    %cst_45 = arith.constant 0.000000e+00 : f32
    %136 = vector.broadcast %cst_45 : f32 to vector<8x32xf32>
    %137 = arith.select %12, %135, %136 : vector<8x32xi1>, vector<8x32xf32>
    %138 = arith.truncf %137 : vector<8x32xf32> to vector<8x32xbf16>
    %c24_46 = arith.constant 24 : index
    %c0_47 = arith.constant 0 : index
    %139 = vector.load %arg10[%c24_46, %c0_47] : memref<64x32xbf16, #tpu.memory_space<vmem>>, vector<8x32xbf16>
    tpu.vector_store %arg10[%c24_46, %c0_47], %138 {strides = array<i32>} : memref<64x32xbf16, #tpu.memory_space<vmem>>, vector<8x32xbf16>,
    %c32 = arith.constant 32 : index
    %c0_48 = arith.constant 0 : index
    %140 = vector.load %arg11[%c32, %c0_48] : memref<64x128xf32, #tpu.memory_space<vmem>>, vector<8x128xf32>
    %141 = arith.truncf %135 : vector<8x32xf32> to vector<8x32xbf16>
    %cst_49 = arith.constant dense<0.000000e+00> : vector<8x128xf32>
    %142 = tpu.matmul %141, %23, %cst_49 {dimension_numbers = #tpu.dot_dimension_numbers<[1], [0], [0], [1], [0, 0, 1, 1], [], []>} : vector<8x32xbf16>, vector<32x128xbf16>, vector<8x128xf32> -> vector<8x128xf32>
    %143 = arith.addf %140, %142 : vector<8x128xf32>
    %cst_50 = arith.constant 5.000000e-01 : f32
    %144 = vector.broadcast %cst_50 : f32 to vector<8x128xf32>
    %145 = arith.mulf %143, %144 : vector<8x128xf32>
    %146 = math.tanh %145 : vector<8x128xf32>
    %cst_51 = arith.constant 5.000000e-01 : f32
    %147 = vector.broadcast %cst_51 : f32 to vector<8x128xf32>
    %148 = arith.mulf %146, %147 : vector<8x128xf32>
    %cst_52 = arith.constant 5.000000e-01 : f32
    %149 = vector.broadcast %cst_52 : f32 to vector<8x128xf32>
    %150 = arith.addf %148, %149 : vector<8x128xf32>
    %151 = math.tanh %143 : vector<8x128xf32>
    %152 = vector.extract_strided_slice %150 {offsets = [0, 0], sizes = [8, 32], strides = [1, 1]} : vector<8x128xf32> to vector<8x32xf32>
    %153 = vector.extract_strided_slice %150 {offsets = [0, 32], sizes = [8, 32], strides = [1, 1]} : vector<8x128xf32> to vector<8x32xf32>
    %154 = vector.extract_strided_slice %151 {offsets = [0, 64], sizes = [8, 32], strides = [1, 1]} : vector<8x128xf32> to vector<8x32xf32>
    %155 = vector.extract_strided_slice %150 {offsets = [0, 96], sizes = [8, 32], strides = [1, 1]} : vector<8x128xf32> to vector<8x32xf32>
    %156 = arith.mulf %153, %134 : vector<8x32xf32>
    %157 = arith.mulf %152, %154 : vector<8x32xf32>
    %158 = arith.addf %156, %157 : vector<8x32xf32>
    %159 = math.tanh %158 : vector<8x32xf32>
    %160 = arith.mulf %155, %159 : vector<8x32xf32>
    %161 = arith.select %14, %158, %134 : vector<8x32xi1>, vector<8x32xf32>
    %162 = arith.select %14, %160, %135 : vector<8x32xi1>, vector<8x32xf32>
    %cst_53 = arith.constant 0.000000e+00 : f32
    %163 = vector.broadcast %cst_53 : f32 to vector<8x32xf32>
    %164 = arith.select %14, %162, %163 : vector<8x32xi1>, vector<8x32xf32>
    %165 = arith.truncf %164 : vector<8x32xf32> to vector<8x32xbf16>
    %c32_54 = arith.constant 32 : index
    %c0_55 = arith.constant 0 : index
    %166 = vector.load %arg10[%c32_54, %c0_55] : memref<64x32xbf16, #tpu.memory_space<vmem>>, vector<8x32xbf16>
    tpu.vector_store %arg10[%c32_54, %c0_55], %165 {strides = array<i32>} : memref<64x32xbf16, #tpu.memory_space<vmem>>, vector<8x32xbf16>,
    %c40 = arith.constant 40 : index
    %c0_56 = arith.constant 0 : index
    %167 = vector.load %arg11[%c40, %c0_56] : memref<64x128xf32, #tpu.memory_space<vmem>>, vector<8x128xf32>
    %168 = arith.truncf %162 : vector<8x32xf32> to vector<8x32xbf16>
    %cst_57 = arith.constant dense<0.000000e+00> : vector<8x128xf32>
    %169 = tpu.matmul %168, %23, %cst_57 {dimension_numbers = #tpu.dot_dimension_numbers<[1], [0], [0], [1], [0, 0, 1, 1], [], []>} : vector<8x32xbf16>, vector<32x128xbf16>, vector<8x128xf32> -> vector<8x128xf32>
    %170 = arith.addf %167, %169 : vector<8x128xf32>
    %cst_58 = arith.constant 5.000000e-01 : f32
    %171 = vector.broadcast %cst_58 : f32 to vector<8x128xf32>
    %172 = arith.mulf %170, %171 : vector<8x128xf32>
    %173 = math.tanh %172 : vector<8x128xf32>
    %cst_59 = arith.constant 5.000000e-01 : f32
    %174 = vector.broadcast %cst_59 : f32 to vector<8x128xf32>
    %175 = arith.mulf %173, %174 : vector<8x128xf32>
    %cst_60 = arith.constant 5.000000e-01 : f32
    %176 = vector.broadcast %cst_60 : f32 to vector<8x128xf32>
    %177 = arith.addf %175, %176 : vector<8x128xf32>
    %178 = math.tanh %170 : vector<8x128xf32>
    %179 = vector.extract_strided_slice %177 {offsets = [0, 0], sizes = [8, 32], strides = [1, 1]} : vector<8x128xf32> to vector<8x32xf32>
    %180 = vector.extract_strided_slice %177 {offsets = [0, 32], sizes = [8, 32], strides = [1, 1]} : vector<8x128xf32> to vector<8x32xf32>
    %181 = vector.extract_strided_slice %178 {offsets = [0, 64], sizes = [8, 32], strides = [1, 1]} : vector<8x128xf32> to vector<8x32xf32>
    %182 = vector.extract_strided_slice %177 {offsets = [0, 96], sizes = [8, 32], strides = [1, 1]} : vector<8x128xf32> to vector<8x32xf32>
    %183 = arith.mulf %180, %161 : vector<8x32xf32>
    %184 = arith.mulf %179, %181 : vector<8x32xf32>
    %185 = arith.addf %183, %184 : vector<8x32xf32>
    %186 = math.tanh %185 : vector<8x32xf32>
    %187 = arith.mulf %182, %186 : vector<8x32xf32>
    %188 = arith.select %16, %185, %161 : vector<8x32xi1>, vector<8x32xf32>
    %189 = arith.select %16, %187, %162 : vector<8x32xi1>, vector<8x32xf32>
    %cst_61 = arith.constant 0.000000e+00 : f32
    %190 = vector.broadcast %cst_61 : f32 to vector<8x32xf32>
    %191 = arith.select %16, %189, %190 : vector<8x32xi1>, vector<8x32xf32>
    %192 = arith.truncf %191 : vector<8x32xf32> to vector<8x32xbf16>
    %c40_62 = arith.constant 40 : index
    %c0_63 = arith.constant 0 : index
    %193 = vector.load %arg10[%c40_62, %c0_63] : memref<64x32xbf16, #tpu.memory_space<vmem>>, vector<8x32xbf16>
    tpu.vector_store %arg10[%c40_62, %c0_63], %192 {strides = array<i32>} : memref<64x32xbf16, #tpu.memory_space<vmem>>, vector<8x32xbf16>,
    %c48 = arith.constant 48 : index
    %c0_64 = arith.constant 0 : index
    %194 = vector.load %arg11[%c48, %c0_64] : memref<64x128xf32, #tpu.memory_space<vmem>>, vector<8x128xf32>
    %195 = arith.truncf %189 : vector<8x32xf32> to vector<8x32xbf16>
    %cst_65 = arith.constant dense<0.000000e+00> : vector<8x128xf32>
    %196 = tpu.matmul %195, %23, %cst_65 {dimension_numbers = #tpu.dot_dimension_numbers<[1], [0], [0], [1], [0, 0, 1, 1], [], []>} : vector<8x32xbf16>, vector<32x128xbf16>, vector<8x128xf32> -> vector<8x128xf32>
    %197 = arith.addf %194, %196 : vector<8x128xf32>
    %cst_66 = arith.constant 5.000000e-01 : f32
    %198 = vector.broadcast %cst_66 : f32 to vector<8x128xf32>
    %199 = arith.mulf %197, %198 : vector<8x128xf32>
    %200 = math.tanh %199 : vector<8x128xf32>
    %cst_67 = arith.constant 5.000000e-01 : f32
    %201 = vector.broadcast %cst_67 : f32 to vector<8x128xf32>
    %202 = arith.mulf %200, %201 : vector<8x128xf32>
    %cst_68 = arith.constant 5.000000e-01 : f32
    %203 = vector.broadcast %cst_68 : f32 to vector<8x128xf32>
    %204 = arith.addf %202, %203 : vector<8x128xf32>
    %205 = math.tanh %197 : vector<8x128xf32>
    %206 = vector.extract_strided_slice %204 {offsets = [0, 0], sizes = [8, 32], strides = [1, 1]} : vector<8x128xf32> to vector<8x32xf32>
    %207 = vector.extract_strided_slice %204 {offsets = [0, 32], sizes = [8, 32], strides = [1, 1]} : vector<8x128xf32> to vector<8x32xf32>
    %208 = vector.extract_strided_slice %205 {offsets = [0, 64], sizes = [8, 32], strides = [1, 1]} : vector<8x128xf32> to vector<8x32xf32>
    %209 = vector.extract_strided_slice %204 {offsets = [0, 96], sizes = [8, 32], strides = [1, 1]} : vector<8x128xf32> to vector<8x32xf32>
    %210 = arith.mulf %207, %188 : vector<8x32xf32>
    %211 = arith.mulf %206, %208 : vector<8x32xf32>
    %212 = arith.addf %210, %211 : vector<8x32xf32>
    %213 = math.tanh %212 : vector<8x32xf32>
    %214 = arith.mulf %209, %213 : vector<8x32xf32>
    %215 = arith.select %18, %212, %188 : vector<8x32xi1>, vector<8x32xf32>
    %216 = arith.select %18, %214, %189 : vector<8x32xi1>, vector<8x32xf32>
    %cst_69 = arith.constant 0.000000e+00 : f32
    %217 = vector.broadcast %cst_69 : f32 to vector<8x32xf32>
    %218 = arith.select %18, %216, %217 : vector<8x32xi1>, vector<8x32xf32>
    %219 = arith.truncf %218 : vector<8x32xf32> to vector<8x32xbf16>
    %c48_70 = arith.constant 48 : index
    %c0_71 = arith.constant 0 : index
    %220 = vector.load %arg10[%c48_70, %c0_71] : memref<64x32xbf16, #tpu.memory_space<vmem>>, vector<8x32xbf16>
    tpu.vector_store %arg10[%c48_70, %c0_71], %219 {strides = array<i32>} : memref<64x32xbf16, #tpu.memory_space<vmem>>, vector<8x32xbf16>,
    %c56 = arith.constant 56 : index
    %c0_72 = arith.constant 0 : index
    %221 = vector.load %arg11[%c56, %c0_72] : memref<64x128xf32, #tpu.memory_space<vmem>>, vector<8x128xf32>
    %222 = arith.truncf %216 : vector<8x32xf32> to vector<8x32xbf16>
    %cst_73 = arith.constant dense<0.000000e+00> : vector<8x128xf32>
    %223 = tpu.matmul %222, %23, %cst_73 {dimension_numbers = #tpu.dot_dimension_numbers<[1], [0], [0], [1], [0, 0, 1, 1], [], []>} : vector<8x32xbf16>, vector<32x128xbf16>, vector<8x128xf32> -> vector<8x128xf32>
    %224 = arith.addf %221, %223 : vector<8x128xf32>
    %cst_74 = arith.constant 5.000000e-01 : f32
    %225 = vector.broadcast %cst_74 : f32 to vector<8x128xf32>
    %226 = arith.mulf %224, %225 : vector<8x128xf32>
    %227 = math.tanh %226 : vector<8x128xf32>
    %cst_75 = arith.constant 5.000000e-01 : f32
    %228 = vector.broadcast %cst_75 : f32 to vector<8x128xf32>
    %229 = arith.mulf %227, %228 : vector<8x128xf32>
    %cst_76 = arith.constant 5.000000e-01 : f32
    %230 = vector.broadcast %cst_76 : f32 to vector<8x128xf32>
    %231 = arith.addf %229, %230 : vector<8x128xf32>
    %232 = math.tanh %224 : vector<8x128xf32>
    %233 = vector.extract_strided_slice %231 {offsets = [0, 0], sizes = [8, 32], strides = [1, 1]} : vector<8x128xf32> to vector<8x32xf32>
    %234 = vector.extract_strided_slice %231 {offsets = [0, 32], sizes = [8, 32], strides = [1, 1]} : vector<8x128xf32> to vector<8x32xf32>
    %235 = vector.extract_strided_slice %232 {offsets = [0, 64], sizes = [8, 32], strides = [1, 1]} : vector<8x128xf32> to vector<8x32xf32>
    %236 = vector.extract_strided_slice %231 {offsets = [0, 96], sizes = [8, 32], strides = [1, 1]} : vector<8x128xf32> to vector<8x32xf32>
    %237 = arith.mulf %234, %215 : vector<8x32xf32>
    %238 = arith.mulf %233, %235 : vector<8x32xf32>
    %239 = arith.addf %237, %238 : vector<8x32xf32>
    %240 = math.tanh %239 : vector<8x32xf32>
    %241 = arith.mulf %236, %240 : vector<8x32xf32>
    %242 = arith.select %20, %241, %216 : vector<8x32xi1>, vector<8x32xf32>
    %cst_77 = arith.constant 0.000000e+00 : f32
    %243 = vector.broadcast %cst_77 : f32 to vector<8x32xf32>
    %244 = arith.select %20, %242, %243 : vector<8x32xi1>, vector<8x32xf32>
    %245 = arith.truncf %244 : vector<8x32xf32> to vector<8x32xbf16>
    %c56_78 = arith.constant 56 : index
    %c0_79 = arith.constant 0 : index
    %246 = vector.load %arg10[%c56_78, %c0_79] : memref<64x32xbf16, #tpu.memory_space<vmem>>, vector<8x32xbf16>
    tpu.vector_store %arg10[%c56_78, %c0_79], %245 {strides = array<i32>} : memref<64x32xbf16, #tpu.memory_space<vmem>>, vector<8x32xbf16>,
    %c0_80 = arith.constant 0 : index
    %c0_81 = arith.constant 0 : index
    %247 = vector.load %arg6[%c0_80, %c0_81] : memref<32x128xbf16, #tpu.memory_space<vmem>>, vector<32x128xbf16>
    %c0_82 = arith.constant 0 : index
    %c0_83 = arith.constant 0 : index
    %248 = vector.load %arg7[%c0_82, %c0_83] : memref<32x128xbf16, #tpu.memory_space<vmem>>, vector<32x128xbf16>
    %c0_84 = arith.constant 0 : index
    %c0_85 = arith.constant 0 : index
    %249 = vector.load %arg8[%c0_84, %c0_85] : memref<1x128xf32, #tpu.memory_space<vmem>>, vector<1x128xf32>
    %c0_86 = arith.constant 0 : index
    %c0_87 = arith.constant 0 : index
    %250 = vector.load %arg10[%c0_86, %c0_87] : memref<64x32xbf16, #tpu.memory_space<vmem>>, vector<64x32xbf16>
    %cst_88 = arith.constant dense<0.000000e+00> : vector<64x128xf32>
    %251 = tpu.matmul %250, %247, %cst_88 {dimension_numbers = #tpu.dot_dimension_numbers<[1], [0], [0], [1], [0, 0, 1, 1], [], []>} : vector<64x32xbf16>, vector<32x128xbf16>, vector<64x128xf32> -> vector<64x128xf32>
    %252 = vector.broadcast %249 : vector<1x128xf32> to vector<64x128xf32>
    %253 = arith.addf %251, %252 : vector<64x128xf32>
    %c0_89 = arith.constant 0 : index
    %c0_90 = arith.constant 0 : index
    %254 = vector.load %arg11[%c0_89, %c0_90] : memref<64x128xf32, #tpu.memory_space<vmem>>, vector<64x128xf32>
    tpu.vector_store %arg11[%c0_89, %c0_90], %253 {strides = array<i32>} : memref<64x128xf32, #tpu.memory_space<vmem>>, vector<64x128xf32>,
    %cst_91 = arith.constant 0.000000e+00 : f32
    %255 = vector.broadcast %cst_91 : f32 to vector<8x32xf32>
    %cst_92 = arith.constant 0.000000e+00 : f32
    %256 = vector.broadcast %cst_92 : f32 to vector<8x32xf32>
    %c0_93 = arith.constant 0 : index
    %c0_94 = arith.constant 0 : index
    %257 = vector.load %arg11[%c0_93, %c0_94] : memref<64x128xf32, #tpu.memory_space<vmem>>, vector<8x128xf32>
    %258 = arith.truncf %255 : vector<8x32xf32> to vector<8x32xbf16>
    %cst_95 = arith.constant dense<0.000000e+00> : vector<8x128xf32>
    %259 = tpu.matmul %258, %248, %cst_95 {dimension_numbers = #tpu.dot_dimension_numbers<[1], [0], [0], [1], [0, 0, 1, 1], [], []>} : vector<8x32xbf16>, vector<32x128xbf16>, vector<8x128xf32> -> vector<8x128xf32>
    %260 = arith.addf %257, %259 : vector<8x128xf32>
    %cst_96 = arith.constant 5.000000e-01 : f32
    %261 = vector.broadcast %cst_96 : f32 to vector<8x128xf32>
    %262 = arith.mulf %260, %261 : vector<8x128xf32>
    %263 = math.tanh %262 : vector<8x128xf32>
    %cst_97 = arith.constant 5.000000e-01 : f32
    %264 = vector.broadcast %cst_97 : f32 to vector<8x128xf32>
    %265 = arith.mulf %263, %264 : vector<8x128xf32>
    %cst_98 = arith.constant 5.000000e-01 : f32
    %266 = vector.broadcast %cst_98 : f32 to vector<8x128xf32>
    %267 = arith.addf %265, %266 : vector<8x128xf32>
    %268 = math.tanh %260 : vector<8x128xf32>
    %269 = vector.extract_strided_slice %267 {offsets = [0, 0], sizes = [8, 32], strides = [1, 1]} : vector<8x128xf32> to vector<8x32xf32>
    %270 = vector.extract_strided_slice %267 {offsets = [0, 32], sizes = [8, 32], strides = [1, 1]} : vector<8x128xf32> to vector<8x32xf32>
    %271 = vector.extract_strided_slice %268 {offsets = [0, 64], sizes = [8, 32], strides = [1, 1]} : vector<8x128xf32> to vector<8x32xf32>
    %272 = vector.extract_strided_slice %267 {offsets = [0, 96], sizes = [8, 32], strides = [1, 1]} : vector<8x128xf32> to vector<8x32xf32>
    %273 = arith.mulf %270, %256 : vector<8x32xf32>
    %274 = arith.mulf %269, %271 : vector<8x32xf32>
    %275 = arith.addf %273, %274 : vector<8x32xf32>
    %276 = math.tanh %275 : vector<8x32xf32>
    %277 = arith.mulf %272, %276 : vector<8x32xf32>
    %278 = arith.select %6, %275, %256 : vector<8x32xi1>, vector<8x32xf32>
    %279 = arith.select %6, %277, %255 : vector<8x32xi1>, vector<8x32xf32>
    %c0_i32_99 = arith.constant 0 : i32
    %280 = vector.broadcast %c0_i32_99 : i32 to vector<8x32xi32>
    %281 = arith.cmpi eq, %4, %280 : vector<8x32xi32>
    %282 = arith.andi %6, %281 : vector<8x32xi1>
    %283 = arith.select %282, %279, %21 : vector<8x32xi1>, vector<8x32xf32>
    %c8_100 = arith.constant 8 : index
    %c0_101 = arith.constant 0 : index
    %284 = vector.load %arg11[%c8_100, %c0_101] : memref<64x128xf32, #tpu.memory_space<vmem>>, vector<8x128xf32>
    %285 = arith.truncf %279 : vector<8x32xf32> to vector<8x32xbf16>
    %cst_102 = arith.constant dense<0.000000e+00> : vector<8x128xf32>
    %286 = tpu.matmul %285, %248, %cst_102 {dimension_numbers = #tpu.dot_dimension_numbers<[1], [0], [0], [1], [0, 0, 1, 1], [], []>} : vector<8x32xbf16>, vector<32x128xbf16>, vector<8x128xf32> -> vector<8x128xf32>
    %287 = arith.addf %284, %286 : vector<8x128xf32>
    %cst_103 = arith.constant 5.000000e-01 : f32
    %288 = vector.broadcast %cst_103 : f32 to vector<8x128xf32>
    %289 = arith.mulf %287, %288 : vector<8x128xf32>
    %290 = math.tanh %289 : vector<8x128xf32>
    %cst_104 = arith.constant 5.000000e-01 : f32
    %291 = vector.broadcast %cst_104 : f32 to vector<8x128xf32>
    %292 = arith.mulf %290, %291 : vector<8x128xf32>
    %cst_105 = arith.constant 5.000000e-01 : f32
    %293 = vector.broadcast %cst_105 : f32 to vector<8x128xf32>
    %294 = arith.addf %292, %293 : vector<8x128xf32>
    %295 = math.tanh %287 : vector<8x128xf32>
    %296 = vector.extract_strided_slice %294 {offsets = [0, 0], sizes = [8, 32], strides = [1, 1]} : vector<8x128xf32> to vector<8x32xf32>
    %297 = vector.extract_strided_slice %294 {offsets = [0, 32], sizes = [8, 32], strides = [1, 1]} : vector<8x128xf32> to vector<8x32xf32>
    %298 = vector.extract_strided_slice %295 {offsets = [0, 64], sizes = [8, 32], strides = [1, 1]} : vector<8x128xf32> to vector<8x32xf32>
    %299 = vector.extract_strided_slice %294 {offsets = [0, 96], sizes = [8, 32], strides = [1, 1]} : vector<8x128xf32> to vector<8x32xf32>
    %300 = arith.mulf %297, %278 : vector<8x32xf32>
    %301 = arith.mulf %296, %298 : vector<8x32xf32>
    %302 = arith.addf %300, %301 : vector<8x32xf32>
    %303 = math.tanh %302 : vector<8x32xf32>
    %304 = arith.mulf %299, %303 : vector<8x32xf32>
    %305 = arith.select %8, %302, %278 : vector<8x32xi1>, vector<8x32xf32>
    %306 = arith.select %8, %304, %279 : vector<8x32xi1>, vector<8x32xf32>
    %c1_i32_106 = arith.constant 1 : i32
    %307 = vector.broadcast %c1_i32_106 : i32 to vector<8x32xi32>
    %308 = arith.cmpi eq, %4, %307 : vector<8x32xi32>
    %309 = arith.andi %8, %308 : vector<8x32xi1>
    %310 = arith.select %309, %306, %283 : vector<8x32xi1>, vector<8x32xf32>
    %c16_107 = arith.constant 16 : index
    %c0_108 = arith.constant 0 : index
    %311 = vector.load %arg11[%c16_107, %c0_108] : memref<64x128xf32, #tpu.memory_space<vmem>>, vector<8x128xf32>
    %312 = arith.truncf %306 : vector<8x32xf32> to vector<8x32xbf16>
    %cst_109 = arith.constant dense<0.000000e+00> : vector<8x128xf32>
    %313 = tpu.matmul %312, %248, %cst_109 {dimension_numbers = #tpu.dot_dimension_numbers<[1], [0], [0], [1], [0, 0, 1, 1], [], []>} : vector<8x32xbf16>, vector<32x128xbf16>, vector<8x128xf32> -> vector<8x128xf32>
    %314 = arith.addf %311, %313 : vector<8x128xf32>
    %cst_110 = arith.constant 5.000000e-01 : f32
    %315 = vector.broadcast %cst_110 : f32 to vector<8x128xf32>
    %316 = arith.mulf %314, %315 : vector<8x128xf32>
    %317 = math.tanh %316 : vector<8x128xf32>
    %cst_111 = arith.constant 5.000000e-01 : f32
    %318 = vector.broadcast %cst_111 : f32 to vector<8x128xf32>
    %319 = arith.mulf %317, %318 : vector<8x128xf32>
    %cst_112 = arith.constant 5.000000e-01 : f32
    %320 = vector.broadcast %cst_112 : f32 to vector<8x128xf32>
    %321 = arith.addf %319, %320 : vector<8x128xf32>
    %322 = math.tanh %314 : vector<8x128xf32>
    %323 = vector.extract_strided_slice %321 {offsets = [0, 0], sizes = [8, 32], strides = [1, 1]} : vector<8x128xf32> to vector<8x32xf32>
    %324 = vector.extract_strided_slice %321 {offsets = [0, 32], sizes = [8, 32], strides = [1, 1]} : vector<8x128xf32> to vector<8x32xf32>
    %325 = vector.extract_strided_slice %322 {offsets = [0, 64], sizes = [8, 32], strides = [1, 1]} : vector<8x128xf32> to vector<8x32xf32>
    %326 = vector.extract_strided_slice %321 {offsets = [0, 96], sizes = [8, 32], strides = [1, 1]} : vector<8x128xf32> to vector<8x32xf32>
    %327 = arith.mulf %324, %305 : vector<8x32xf32>
    %328 = arith.mulf %323, %325 : vector<8x32xf32>
    %329 = arith.addf %327, %328 : vector<8x32xf32>
    %330 = math.tanh %329 : vector<8x32xf32>
    %331 = arith.mulf %326, %330 : vector<8x32xf32>
    %332 = arith.select %10, %329, %305 : vector<8x32xi1>, vector<8x32xf32>
    %333 = arith.select %10, %331, %306 : vector<8x32xi1>, vector<8x32xf32>
    %c2_i32_113 = arith.constant 2 : i32
    %334 = vector.broadcast %c2_i32_113 : i32 to vector<8x32xi32>
    %335 = arith.cmpi eq, %4, %334 : vector<8x32xi32>
    %336 = arith.andi %10, %335 : vector<8x32xi1>
    %337 = arith.select %336, %333, %310 : vector<8x32xi1>, vector<8x32xf32>
    %c24_114 = arith.constant 24 : index
    %c0_115 = arith.constant 0 : index
    %338 = vector.load %arg11[%c24_114, %c0_115] : memref<64x128xf32, #tpu.memory_space<vmem>>, vector<8x128xf32>
    %339 = arith.truncf %333 : vector<8x32xf32> to vector<8x32xbf16>
    %cst_116 = arith.constant dense<0.000000e+00> : vector<8x128xf32>
    %340 = tpu.matmul %339, %248, %cst_116 {dimension_numbers = #tpu.dot_dimension_numbers<[1], [0], [0], [1], [0, 0, 1, 1], [], []>} : vector<8x32xbf16>, vector<32x128xbf16>, vector<8x128xf32> -> vector<8x128xf32>
    %341 = arith.addf %338, %340 : vector<8x128xf32>
    %cst_117 = arith.constant 5.000000e-01 : f32
    %342 = vector.broadcast %cst_117 : f32 to vector<8x128xf32>
    %343 = arith.mulf %341, %342 : vector<8x128xf32>
    %344 = math.tanh %343 : vector<8x128xf32>
    %cst_118 = arith.constant 5.000000e-01 : f32
    %345 = vector.broadcast %cst_118 : f32 to vector<8x128xf32>
    %346 = arith.mulf %344, %345 : vector<8x128xf32>
    %cst_119 = arith.constant 5.000000e-01 : f32
    %347 = vector.broadcast %cst_119 : f32 to vector<8x128xf32>
    %348 = arith.addf %346, %347 : vector<8x128xf32>
    %349 = math.tanh %341 : vector<8x128xf32>
    %350 = vector.extract_strided_slice %348 {offsets = [0, 0], sizes = [8, 32], strides = [1, 1]} : vector<8x128xf32> to vector<8x32xf32>
    %351 = vector.extract_strided_slice %348 {offsets = [0, 32], sizes = [8, 32], strides = [1, 1]} : vector<8x128xf32> to vector<8x32xf32>
    %352 = vector.extract_strided_slice %349 {offsets = [0, 64], sizes = [8, 32], strides = [1, 1]} : vector<8x128xf32> to vector<8x32xf32>
    %353 = vector.extract_strided_slice %348 {offsets = [0, 96], sizes = [8, 32], strides = [1, 1]} : vector<8x128xf32> to vector<8x32xf32>
    %354 = arith.mulf %351, %332 : vector<8x32xf32>
    %355 = arith.mulf %350, %352 : vector<8x32xf32>
    %356 = arith.addf %354, %355 : vector<8x32xf32>
    %357 = math.tanh %356 : vector<8x32xf32>
    %358 = arith.mulf %353, %357 : vector<8x32xf32>
    %359 = arith.select %12, %356, %332 : vector<8x32xi1>, vector<8x32xf32>
    %360 = arith.select %12, %358, %333 : vector<8x32xi1>, vector<8x32xf32>
    %c3_i32_120 = arith.constant 3 : i32
    %361 = vector.broadcast %c3_i32_120 : i32 to vector<8x32xi32>
    %362 = arith.cmpi eq, %4, %361 : vector<8x32xi32>
    %363 = arith.andi %12, %362 : vector<8x32xi1>
    %364 = arith.select %363, %360, %337 : vector<8x32xi1>, vector<8x32xf32>
    %c32_121 = arith.constant 32 : index
    %c0_122 = arith.constant 0 : index
    %365 = vector.load %arg11[%c32_121, %c0_122] : memref<64x128xf32, #tpu.memory_space<vmem>>, vector<8x128xf32>
    %366 = arith.truncf %360 : vector<8x32xf32> to vector<8x32xbf16>
    %cst_123 = arith.constant dense<0.000000e+00> : vector<8x128xf32>
    %367 = tpu.matmul %366, %248, %cst_123 {dimension_numbers = #tpu.dot_dimension_numbers<[1], [0], [0], [1], [0, 0, 1, 1], [], []>} : vector<8x32xbf16>, vector<32x128xbf16>, vector<8x128xf32> -> vector<8x128xf32>
    %368 = arith.addf %365, %367 : vector<8x128xf32>
    %cst_124 = arith.constant 5.000000e-01 : f32
    %369 = vector.broadcast %cst_124 : f32 to vector<8x128xf32>
    %370 = arith.mulf %368, %369 : vector<8x128xf32>
    %371 = math.tanh %370 : vector<8x128xf32>
    %cst_125 = arith.constant 5.000000e-01 : f32
    %372 = vector.broadcast %cst_125 : f32 to vector<8x128xf32>
    %373 = arith.mulf %371, %372 : vector<8x128xf32>
    %cst_126 = arith.constant 5.000000e-01 : f32
    %374 = vector.broadcast %cst_126 : f32 to vector<8x128xf32>
    %375 = arith.addf %373, %374 : vector<8x128xf32>
    %376 = math.tanh %368 : vector<8x128xf32>
    %377 = vector.extract_strided_slice %375 {offsets = [0, 0], sizes = [8, 32], strides = [1, 1]} : vector<8x128xf32> to vector<8x32xf32>
    %378 = vector.extract_strided_slice %375 {offsets = [0, 32], sizes = [8, 32], strides = [1, 1]} : vector<8x128xf32> to vector<8x32xf32>
    %379 = vector.extract_strided_slice %376 {offsets = [0, 64], sizes = [8, 32], strides = [1, 1]} : vector<8x128xf32> to vector<8x32xf32>
    %380 = vector.extract_strided_slice %375 {offsets = [0, 96], sizes = [8, 32], strides = [1, 1]} : vector<8x128xf32> to vector<8x32xf32>
    %381 = arith.mulf %378, %359 : vector<8x32xf32>
    %382 = arith.mulf %377, %379 : vector<8x32xf32>
    %383 = arith.addf %381, %382 : vector<8x32xf32>
    %384 = math.tanh %383 : vector<8x32xf32>
    %385 = arith.mulf %380, %384 : vector<8x32xf32>
    %386 = arith.select %14, %383, %359 : vector<8x32xi1>, vector<8x32xf32>
    %387 = arith.select %14, %385, %360 : vector<8x32xi1>, vector<8x32xf32>
    %c4_i32_127 = arith.constant 4 : i32
    %388 = vector.broadcast %c4_i32_127 : i32 to vector<8x32xi32>
    %389 = arith.cmpi eq, %4, %388 : vector<8x32xi32>
    %390 = arith.andi %14, %389 : vector<8x32xi1>
    %391 = arith.select %390, %387, %364 : vector<8x32xi1>, vector<8x32xf32>
    %c40_128 = arith.constant 40 : index
    %c0_129 = arith.constant 0 : index
    %392 = vector.load %arg11[%c40_128, %c0_129] : memref<64x128xf32, #tpu.memory_space<vmem>>, vector<8x128xf32>
    %393 = arith.truncf %387 : vector<8x32xf32> to vector<8x32xbf16>
    %cst_130 = arith.constant dense<0.000000e+00> : vector<8x128xf32>
    %394 = tpu.matmul %393, %248, %cst_130 {dimension_numbers = #tpu.dot_dimension_numbers<[1], [0], [0], [1], [0, 0, 1, 1], [], []>} : vector<8x32xbf16>, vector<32x128xbf16>, vector<8x128xf32> -> vector<8x128xf32>
    %395 = arith.addf %392, %394 : vector<8x128xf32>
    %cst_131 = arith.constant 5.000000e-01 : f32
    %396 = vector.broadcast %cst_131 : f32 to vector<8x128xf32>
    %397 = arith.mulf %395, %396 : vector<8x128xf32>
    %398 = math.tanh %397 : vector<8x128xf32>
    %cst_132 = arith.constant 5.000000e-01 : f32
    %399 = vector.broadcast %cst_132 : f32 to vector<8x128xf32>
    %400 = arith.mulf %398, %399 : vector<8x128xf32>
    %cst_133 = arith.constant 5.000000e-01 : f32
    %401 = vector.broadcast %cst_133 : f32 to vector<8x128xf32>
    %402 = arith.addf %400, %401 : vector<8x128xf32>
    %403 = math.tanh %395 : vector<8x128xf32>
    %404 = vector.extract_strided_slice %402 {offsets = [0, 0], sizes = [8, 32], strides = [1, 1]} : vector<8x128xf32> to vector<8x32xf32>
    %405 = vector.extract_strided_slice %402 {offsets = [0, 32], sizes = [8, 32], strides = [1, 1]} : vector<8x128xf32> to vector<8x32xf32>
    %406 = vector.extract_strided_slice %403 {offsets = [0, 64], sizes = [8, 32], strides = [1, 1]} : vector<8x128xf32> to vector<8x32xf32>
    %407 = vector.extract_strided_slice %402 {offsets = [0, 96], sizes = [8, 32], strides = [1, 1]} : vector<8x128xf32> to vector<8x32xf32>
    %408 = arith.mulf %405, %386 : vector<8x32xf32>
    %409 = arith.mulf %404, %406 : vector<8x32xf32>
    %410 = arith.addf %408, %409 : vector<8x32xf32>
    %411 = math.tanh %410 : vector<8x32xf32>
    %412 = arith.mulf %407, %411 : vector<8x32xf32>
    %413 = arith.select %16, %410, %386 : vector<8x32xi1>, vector<8x32xf32>
    %414 = arith.select %16, %412, %387 : vector<8x32xi1>, vector<8x32xf32>
    %c5_i32_134 = arith.constant 5 : i32
    %415 = vector.broadcast %c5_i32_134 : i32 to vector<8x32xi32>
    %416 = arith.cmpi eq, %4, %415 : vector<8x32xi32>
    %417 = arith.andi %16, %416 : vector<8x32xi1>
    %418 = arith.select %417, %414, %391 : vector<8x32xi1>, vector<8x32xf32>
    %c48_135 = arith.constant 48 : index
    %c0_136 = arith.constant 0 : index
    %419 = vector.load %arg11[%c48_135, %c0_136] : memref<64x128xf32, #tpu.memory_space<vmem>>, vector<8x128xf32>
    %420 = arith.truncf %414 : vector<8x32xf32> to vector<8x32xbf16>
    %cst_137 = arith.constant dense<0.000000e+00> : vector<8x128xf32>
    %421 = tpu.matmul %420, %248, %cst_137 {dimension_numbers = #tpu.dot_dimension_numbers<[1], [0], [0], [1], [0, 0, 1, 1], [], []>} : vector<8x32xbf16>, vector<32x128xbf16>, vector<8x128xf32> -> vector<8x128xf32>
    %422 = arith.addf %419, %421 : vector<8x128xf32>
    %cst_138 = arith.constant 5.000000e-01 : f32
    %423 = vector.broadcast %cst_138 : f32 to vector<8x128xf32>
    %424 = arith.mulf %422, %423 : vector<8x128xf32>
    %425 = math.tanh %424 : vector<8x128xf32>
    %cst_139 = arith.constant 5.000000e-01 : f32
    %426 = vector.broadcast %cst_139 : f32 to vector<8x128xf32>
    %427 = arith.mulf %425, %426 : vector<8x128xf32>
    %cst_140 = arith.constant 5.000000e-01 : f32
    %428 = vector.broadcast %cst_140 : f32 to vector<8x128xf32>
    %429 = arith.addf %427, %428 : vector<8x128xf32>
    %430 = math.tanh %422 : vector<8x128xf32>
    %431 = vector.extract_strided_slice %429 {offsets = [0, 0], sizes = [8, 32], strides = [1, 1]} : vector<8x128xf32> to vector<8x32xf32>
    %432 = vector.extract_strided_slice %429 {offsets = [0, 32], sizes = [8, 32], strides = [1, 1]} : vector<8x128xf32> to vector<8x32xf32>
    %433 = vector.extract_strided_slice %430 {offsets = [0, 64], sizes = [8, 32], strides = [1, 1]} : vector<8x128xf32> to vector<8x32xf32>
    %434 = vector.extract_strided_slice %429 {offsets = [0, 96], sizes = [8, 32], strides = [1, 1]} : vector<8x128xf32> to vector<8x32xf32>
    %435 = arith.mulf %432, %413 : vector<8x32xf32>
    %436 = arith.mulf %431, %433 : vector<8x32xf32>
    %437 = arith.addf %435, %436 : vector<8x32xf32>
    %438 = math.tanh %437 : vector<8x32xf32>
    %439 = arith.mulf %434, %438 : vector<8x32xf32>
    %440 = arith.select %18, %437, %413 : vector<8x32xi1>, vector<8x32xf32>
    %441 = arith.select %18, %439, %414 : vector<8x32xi1>, vector<8x32xf32>
    %c6_i32_141 = arith.constant 6 : i32
    %442 = vector.broadcast %c6_i32_141 : i32 to vector<8x32xi32>
    %443 = arith.cmpi eq, %4, %442 : vector<8x32xi32>
    %444 = arith.andi %18, %443 : vector<8x32xi1>
    %445 = arith.select %444, %441, %418 : vector<8x32xi1>, vector<8x32xf32>
    %c56_142 = arith.constant 56 : index
    %c0_143 = arith.constant 0 : index
    %446 = vector.load %arg11[%c56_142, %c0_143] : memref<64x128xf32, #tpu.memory_space<vmem>>, vector<8x128xf32>
    %447 = arith.truncf %441 : vector<8x32xf32> to vector<8x32xbf16>
    %cst_144 = arith.constant dense<0.000000e+00> : vector<8x128xf32>
    %448 = tpu.matmul %447, %248, %cst_144 {dimension_numbers = #tpu.dot_dimension_numbers<[1], [0], [0], [1], [0, 0, 1, 1], [], []>} : vector<8x32xbf16>, vector<32x128xbf16>, vector<8x128xf32> -> vector<8x128xf32>
    %449 = arith.addf %446, %448 : vector<8x128xf32>
    %cst_145 = arith.constant 5.000000e-01 : f32
    %450 = vector.broadcast %cst_145 : f32 to vector<8x128xf32>
    %451 = arith.mulf %449, %450 : vector<8x128xf32>
    %452 = math.tanh %451 : vector<8x128xf32>
    %cst_146 = arith.constant 5.000000e-01 : f32
    %453 = vector.broadcast %cst_146 : f32 to vector<8x128xf32>
    %454 = arith.mulf %452, %453 : vector<8x128xf32>
    %cst_147 = arith.constant 5.000000e-01 : f32
    %455 = vector.broadcast %cst_147 : f32 to vector<8x128xf32>
    %456 = arith.addf %454, %455 : vector<8x128xf32>
    %457 = math.tanh %449 : vector<8x128xf32>
    %458 = vector.extract_strided_slice %456 {offsets = [0, 0], sizes = [8, 32], strides = [1, 1]} : vector<8x128xf32> to vector<8x32xf32>
    %459 = vector.extract_strided_slice %456 {offsets = [0, 32], sizes = [8, 32], strides = [1, 1]} : vector<8x128xf32> to vector<8x32xf32>
    %460 = vector.extract_strided_slice %457 {offsets = [0, 64], sizes = [8, 32], strides = [1, 1]} : vector<8x128xf32> to vector<8x32xf32>
    %461 = vector.extract_strided_slice %456 {offsets = [0, 96], sizes = [8, 32], strides = [1, 1]} : vector<8x128xf32> to vector<8x32xf32>
    %462 = arith.mulf %459, %440 : vector<8x32xf32>
    %463 = arith.mulf %458, %460 : vector<8x32xf32>
    %464 = arith.addf %462, %463 : vector<8x32xf32>
    %465 = math.tanh %464 : vector<8x32xf32>
    %466 = arith.mulf %461, %465 : vector<8x32xf32>
    %467 = arith.select %20, %466, %441 : vector<8x32xi1>, vector<8x32xf32>
    %c7_i32_148 = arith.constant 7 : i32
    %468 = vector.broadcast %c7_i32_148 : i32 to vector<8x32xi32>
    %469 = arith.cmpi eq, %4, %468 : vector<8x32xi32>
    %470 = arith.andi %20, %469 : vector<8x32xi1>
    %471 = arith.select %470, %467, %445 : vector<8x32xi1>, vector<8x32xf32>
    %c0_149 = arith.constant 0 : index
    %c0_150 = arith.constant 0 : index
    %472 = vector.load %arg9[%c0_149, %c0_150] : memref<8x32xf32, #tpu.memory_space<vmem>>, vector<8x32xf32>
    tpu.vector_store %arg9[%c0_149, %c0_150], %471 {strides = array<i32>} : memref<8x32xf32, #tpu.memory_space<vmem>>, vector<8x32xf32>,
    return
  }
}

</mosaic_0001>

<bundles_post_ra>
// kernel: tpu_custom_call.1
= control target key start
LH: loop header
LB: loop body
LE: loop exit
PB: predicated region body
PF: predicated region fallthrough
CT: control target
= control target key end

     0   :  { %v2031_v1 = vmov 0.0   ;;  %vm2032_vm0 = vmmov 0   ;;  %vm2588_vm1 = vcmask 261120   ;;  %v2033_v7 = vmov 0   ;;  %s2578_s0 = inlined_call_operand.vmem [shape: bf16[64,32], index: 0, kind: input, shape index: {}]   ;;  %s2579_s1 = inlined_call_operand.vmem [shape: s32[8,1], index: 1, kind: input, shape index: {}]   ;;  %s2580_s2 = inlined_call_operand.<no memory space> [shape: s32[1], index: 2, kind: input, shape index: {}]   ;;  %s2581_s3 = inlined_call_operand.vmem [shape: bf16[32,128], index: 3, kind: input, shape index: {}]   ;;  %s2582_s4 = inlined_call_operand.vmem [shape: bf16[32,128], index: 4, kind: input, shape index: {}]   ;;  %s2583_s5 = inlined_call_operand.vmem [shape: f32[1,128], index: 5, kind: input, shape index: {}]   ;;  %s2584_s6 = inlined_call_operand.vmem [shape: bf16[32,128], index: 6, kind: input, shape index: {}]   ;;  %s2585_s7 = inlined_call_operand.vmem [shape: bf16[32,128], index: 7, kind: input, shape index: {}]   ;;  %s2586_s8 = inlined_call_operand.vmem [shape: f32[1,128], index: 8, kind: input, shape index: {}]   ;;  %s2587_s9 = inlined_call_operand.hbm [shape: f32[8,32], index: 9, kind: output, shape index: {}]  }
   0x1   :  { %v1897_v0 = vld [vmem:[%s2581_s3 + $0x8] sm:$0xff]   ;;  %1749 = vmatprep.subr.bf16.mxu1 %v2031_v1  ;;  %v1899_v3 = vld [vmem:[%s2581_s3] sm:$0xff]   ;;  %1753 = vmatprep.mubr.msk.bf16.mxu1 %vm2032_vm0, %v2031_v1 }
   0x2   :  { %v2094_v2 = vld [vmem:[%s2582_s4 + $0x8] sm:$0xff]   ;;  %1737 = vmatprep.subr.bf16.mxu0 %v1897_v0  ;;  %v2105_v4 = vld [vmem:[%s2582_s4] sm:$0xff]   ;;  %1895 = vset.pattern.permute.xlu1 %v2033_v7 }
   0x3   :  { %1750 = vmatpush3.bf16.msra.mxu1 %v2094_v2  ;;  %1738 = vmatpush3.bf16.msra.mxu0 %v1897_v0  ;;  %v1901_v5 = vld [vmem:[%s2578_s0] sm:$0xff]   ;;  %v1902_v6 = vld [vmem:[%s2578_s0 + $0x8] sm:$0xff]  }
   0x4   :  { %1751 = vmatprep.subr.bf16.mxu1 %v2031_v1  ;;  %1739 = vmatprep.subr.bf16.mxu0 %v1899_v3 }
   0x5   :  { %1896 = vset.pattern.permute.xlu0 %v2033_v7  ;;  %1741 = vmatprep.mubr.msk.bf16.mxu0 %vm2588_vm1, %v1901_v5 }
   0x7   :  { %1752 = vmatpush3.bf16.msra.mxu1 %v2105_v4  ;;  %1740 = vmatpush3.bf16.msra.mxu0 %v1899_v3 }
   0x8   :  { %1757 = vmatprep.subr.bf16.mxu1 %v2031_v1  ;;  %1765 = vmatprep.subr.bf16.mxu0 %v2031_v1 }
   0xa   :  { %1754 = vmatmul.mubr.bf16.vlgmr.msra.gmra.mxu1 %v2033_v7  ;;  %1742 = vmatmul.mubr.msk.bf16.vlgmr.msra.gmra.mxu0 %vm2588_vm1, %v1902_v6 }
   0xb   :  { %15 = vsyncpa [#allocation6], 0  ;;  %1758 = vmatpush3.bf16.msra.mxu1 %v2094_v2  ;;  %1761 = vmatprep.mubr.msk.bf16.mxu1 %vm2032_vm0, %v2031_v1  ;;  %v35_v8 = vld [vmem:[%s2579_s1] sm:$0xff]  ;;  %s2034_s23 = smov 64   ;;  %s2035_s1 = smov 32   ;;  %v1903_v54 = vld [vmem:[%s2578_s0 + $0x10] sm:$0xff]  }
   0xc   :  { %1759 = vmatprep.subr.bf16.mxu1 %v2031_v1  ;;  %1766 = vmatpush3.bf16.msra.mxu0 %v2094_v2  ;;  %v2140_v11 = vld [vmem:[%s2583_s5] ss:$0 sm:$0xff]  ;;  %v1904_v55 = vld [vmem:[%s2578_s0 + $0x18] sm:$0xff]   ;;  %vm278_vm8 = vcmask 257024  }
   0xd   :  { %1767 = vmatprep.subr.bf16.mxu0 %v2031_v1  ;;  %37 = vperm.xlu1 %1895, %v35_v8  }
   0xe   :  { %1745 = vmatprep.mubr.msk.bf16.mxu0 %vm2588_vm1, %v1903_v54 }
   0xf   :  { %1760 = vmatpush3.bf16.msra.mxu1 %v2105_v4 }
  0x10   :  { %1768 = vmatpush3.bf16.msra.mxu0 %v2105_v4  ;;  %1773 = vmatprep.subr.bf16.mxu1 %v2031_v1 }
  0x11   :  { %1781 = vmatprep.subr.bf16.mxu0 %v2031_v1 }
  0x12   :  { %1746 = vmatmul.mubr.msk.bf16.gmra.mxu0 %vm2588_vm1, %v1904_v55 }
  0x13   :  { %1769 = vmatprep.mubr.msk.bf16.mxu0 %vm2032_vm0, %v2031_v1 }
  0x88   :  { %v2146_v29 = vpop.permute.xlu1 %37 }
  0x89   :  { %vm41_vm2 = vcmp.gt.s32.totalorder %v2146_v29, 0  ;;  %vm42_vm3 = vcmp.gt.s32.totalorder %v2146_v29, 1  ;;  %vm43_vm4 = vcmp.gt.s32.totalorder %v2146_v29, 2  ;;  %vm44_vm5 = vcmp.gt.s32.totalorder %v2146_v29, 3 }
  0x8a   :  { %vm45_vm6 = vcmp.gt.s32.totalorder %v2146_v29, 4  ;;  %vm2591_vm7 = vcmp.gt.s32.totalorder %v2146_v29, 5  ;;  %vm2590_vm9 = vcmp.gt.s32.totalorder %v2146_v29, 6  ;;  %vm2589_vm10 = vcmp.gt.s32.totalorder %v2146_v29, 7 }
  0xca   :  { %v240_v9 = vpop.f32.mrf.mxu1  ;;  %v2135_v10 = vpop.f32.mrf.mxu0 }
  0xcb   :  { %v160_v5 = vadd.f32 %v2135_v10, %v2140_v11 }
  0xcc   :  { %v1755_v12 = vpop.f32.mrf.mxu1  ;;  %v151_v13 = vpop.f32.mrf.mxu0 }
  0xcd   :  { %v152_v14 = vadd.f32 %v2140_v11, %v151_v13 }
  0xce   :  { %v243_v15 = vpop.f32.mrf.mxu1  ;;  %v2162_v35 = vpop.f32.mrf.mxu0 }
  0xcf   :  { %v246_v16 = vadd.f32 %v240_v9, %v152_v14 }
  0xd0   :  { %v1756_v17 = vpop.f32.mrf.mxu1  ;;  %v154_v36 = vpop.f32.mrf.mxu0 }
  0xd1   :  { %1913 = vtanh.f32 %v246_v16  ;;  %v247_v19 = vmul.f32 0.5, %v246_v16  ;;  %v155_v37 = vadd.f32 %v2140_v11, %v154_v36 }
  0xd2   :  { %v2194_v62 = vpop.f32.mrf.mxu0 }
  0xd3   :  { %1915 = vtanh.f32 %v247_v19 }
  0xd4   :  { %v2196_v63 = vpop.f32.mrf.mxu0 }
  0xd5   :  { %v168_v55 = vadd.f32 %v2140_v11, %v2196_v63 }
  0xd6   :  { %v2198_v0 = vpop.f32.mrf.mxu0 }
  0xd8   :  { %v2200_v3 = vpop.f32.mrf.mxu0 }
  0xde   :  { %v1914_v18 = vpop.eup %1913 }
  0xdf   :  { %254 = vrot.lane.b32.xlu0 %v1914_v18, %s2034_s23 }
  0xe0   :  { %v1916_v20 = vpop.eup %1915 }
  0xe1   :  { %v249_v21 = vmul.f32 0.5, %v1916_v20 }
  0xe3   :  { %v250_v22 = vadd.f32 0.5, %v249_v21 }
  0xe5   :  { %v252_v25 = vmul.f32 0.0, %v250_v22 }
 0x151   :  { %v255_v23 = vpop.permute.xlu0 %254 }
 0x152   :  { %v257_v24 = vmul.f32 %v255_v23, %v250_v22 }
 0x154   :  { %259 = vrot.lane.b32.xlu0 %v257_v24, %s2035_s1 }
 0x1c6   :  { %v260_v26 = vpop.permute.xlu0 %259 }
 0x1c7   :  { %v262_v27 = vadd.f32 %v260_v26, %v252_v25 }
 0x1c9   :  { %1917 = vtanh.f32 %v262_v27  ;;  %v269_v50 = vsel %vm41_vm2, %v262_v27, 0.0 }
 0x1d6   :  { %v1918_v28 = vpop.eup %1917 }
 0x1d7   :  { %265 = vrot.lane.b32.xlu1 %v1918_v28, %s2034_s23 }
 0x249   :  { %v266_v30 = vpop.permute.xlu1 %265 }
 0x24a   :  { %v268_v31 = vmul.f32 %v266_v30, %v250_v22 }
 0x24c   :  { %v270_v32 = vsel %vm41_vm2, %v268_v31, 0.0  ;;  %v163_v31 = vadd.f32 %v2162_v35, %v2140_v11 }
 0x24d   :  { %v2151_v33 = vpack.c.bf16 %v270_v32, %v270_v32 }
 0x24f   :  { %281 = vrot.lane.b32.xlu0 %v2151_v33, %s2035_s1 }
 0x2c1   :  { %v282_v34 = vpop.permute.xlu0 %281 }
 0x2c2   :  { %1762 = vmatmul.mubr.msk.bf16.vlgmr.msra.gmra.mxu1 %vm2588_vm1, %v282_v34 }
 0x2c3   :  { %1774 = vmatpush3.bf16.msra.mxu1 %v2094_v2  ;;  %1777 = vmatprep.mubr.msk.bf16.mxu1 %vm2032_vm0, %v2031_v1 }
 0x2c4   :  { %1775 = vmatprep.subr.bf16.mxu1 %v2031_v1 }
 0x2c7   :  { %1776 = vmatpush3.bf16.msra.mxu1 %v2105_v4 }
 0x2c8   :  { %1789 = vmatprep.subr.bf16.mxu1 %v2031_v1 }
 0x382   :  { %v320_v38 = vpop.f32.mrf.mxu1 }
 0x383   :  { %v326_v39 = vadd.f32 %v320_v38, %v155_v37 }
 0x384   :  { %v1763_v40 = vpop.f32.mrf.mxu1 }
 0x385   :  { %1919 = vtanh.f32 %v326_v39  ;;  %v327_v44 = vmul.f32 0.5, %v326_v39 }
 0x386   :  { %v323_v41 = vpop.f32.mrf.mxu1 }
 0x387   :  { %1921 = vtanh.f32 %v327_v44 }
 0x388   :  { %v1764_v42 = vpop.f32.mrf.mxu1 }
 0x392   :  { %v1920_v43 = vpop.eup %1919 }
 0x393   :  { %334 = vrot.lane.b32.xlu1 %v1920_v43, %s2034_s23 }
 0x394   :  { %v1922_v45 = vpop.eup %1921 }
 0x395   :  { %v329_v46 = vmul.f32 0.5, %v1922_v45 }
 0x397   :  { %v330_v47 = vadd.f32 0.5, %v329_v46 }
 0x399   :  { %v332_v51 = vmul.f32 %v330_v47, %v269_v50 }
 0x405   :  { %v335_v48 = vpop.permute.xlu1 %334 }
 0x406   :  { %v337_v49 = vmul.f32 %v335_v48, %v330_v47 }
 0x408   :  { %339 = vrot.lane.b32.xlu0 %v337_v49, %s2035_s1 }
 0x47a   :  { %v340_v52 = vpop.permute.xlu0 %339 }
 0x47b   :  { %v342_v53 = vadd.f32 %v340_v52, %v332_v51 }
 0x47d   :  { %1923 = vtanh.f32 %v342_v53  ;;  %v349_v10 = vsel %vm42_vm3, %v342_v53, %v269_v50 }
 0x48a   :  { %v1924_v56 = vpop.eup %1923 }
 0x48b   :  { %345 = vrot.lane.b32.xlu1 %v1924_v56, %s2034_s23 }
 0x4fd   :  { %v346_v57 = vpop.permute.xlu1 %345 }
 0x4fe   :  { %v2180_v58 = vmul.f32 %v346_v57, %v330_v47 }
 0x500   :  { %v350_v59 = vsel %vm42_vm3, %v2180_v58, %v270_v32 }
 0x501   :  { %v361_v60 = vpack.c.bf16 %v350_v59, %v350_v59 }
 0x503   :  { %363 = vrot.lane.b32.xlu0 %v361_v60, %s2035_s1 }
 0x575   :  { %v364_v61 = vpop.permute.xlu0 %363 }
 0x576   :  { %1770 = vmatmul.mubr.msk.bf16.vlgmr.msra.gmra.mxu0 %vm2588_vm1, %v364_v61 }
 0x577   :  { %1782 = vmatpush3.bf16.msra.mxu0 %v2094_v2  ;;  %1785 = vmatprep.mubr.msk.bf16.mxu0 %vm2032_vm0, %v2031_v1 }
 0x578   :  { %1783 = vmatprep.subr.bf16.mxu0 %v2031_v1 }
 0x57b   :  { %1784 = vmatpush3.bf16.msra.mxu0 %v2105_v4 }
 0x57c   :  { %1797 = vmatprep.subr.bf16.mxu0 %v2031_v1 }
 0x636   :  { %v402_v6 = vpop.f32.mrf.mxu0 }
 0x637   :  { %v408_v8 = vadd.f32 %v402_v6, %v160_v5 }
 0x638   :  { %v1771_v9 = vpop.f32.mrf.mxu0 }
 0x639   :  { %1925 = vtanh.f32 %v408_v8  ;;  %v409_v15 = vmul.f32 0.5, %v408_v8 }
 0x63a   :  { %v405_v12 = vpop.f32.mrf.mxu0 }
 0x63b   :  { %1927 = vtanh.f32 %v409_v15 }
 0x63c   :  { %v1772_v13 = vpop.f32.mrf.mxu0 }
 0x646   :  { %v1926_v14 = vpop.eup %1925 }
 0x647   :  { %416 = vrot.lane.b32.xlu1 %v1926_v14, %s2034_s23 }
 0x648   :  { %v1928_v16 = vpop.eup %1927 }
 0x649   :  { %v411_v17 = vmul.f32 0.5, %v1928_v16 }
 0x64b   :  { %v412_v18 = vadd.f32 0.5, %v411_v17 }
 0x64d   :  { %v414_v21 = vmul.f32 %v412_v18, %v349_v10 }
 0x6b9   :  { %v417_v19 = vpop.permute.xlu1 %416 }
 0x6ba   :  { %v419_v20 = vmul.f32 %v417_v19, %v412_v18 }
 0x6bc   :  { %421 = vrot.lane.b32.xlu0 %v419_v20, %s2035_s1 }
 0x72e   :  { %v422_v22 = vpop.permute.xlu0 %421 }
 0x72f   :  { %v424_v23 = vadd.f32 %v422_v22, %v414_v21 }
 0x731   :  { %1929 = vtanh.f32 %v424_v23  ;;  %v431_v35 = vsel %vm43_vm4, %v424_v23, %v349_v10  ;;  %v171_v23 = vadd.f32 %v2140_v11, %v2200_v3 }
 0x73e   :  { %v1930_v24 = vpop.eup %1929 }
 0x73f   :  { %427 = vrot.lane.b32.xlu1 %v1930_v24, %s2034_s23 }
 0x7b1   :  { %v428_v25 = vpop.permute.xlu1 %427 }
 0x7b2   :  { %v2209_v26 = vmul.f32 %v428_v25, %v412_v18 }
 0x7b4   :  { %v432_v27 = vsel %vm43_vm4, %v2209_v26, %v350_v59 }
 0x7b5   :  { %v443_v28 = vpack.c.bf16 %v432_v27, %v432_v27 }
 0x7b7   :  { %445 = vrot.lane.b32.xlu0 %v443_v28, %s2035_s1 }
 0x829   :  { %v446_v30 = vpop.permute.xlu0 %445 }
 0x82a   :  { %1778 = vmatmul.mubr.msk.bf16.vlgmr.msra.gmra.mxu1 %vm2588_vm1, %v446_v30 }
 0x82b   :  { %1790 = vmatpush3.bf16.msra.mxu1 %v2094_v2  ;;  %1793 = vmatprep.mubr.msk.bf16.mxu1 %vm2032_vm0, %v2031_v1 }
 0x82c   :  { %1791 = vmatprep.subr.bf16.mxu1 %v2031_v1 }
 0x82f   :  { %1792 = vmatpush3.bf16.msra.mxu1 %v2105_v4 }
 0x830   :  { %1805 = vmatprep.subr.bf16.mxu1 %v2031_v1 }
 0x8ea   :  { %v484_v32 = vpop.f32.mrf.mxu1 }
 0x8eb   :  { %v490_v34 = vadd.f32 %v484_v32, %v163_v31 }
 0x8ec   :  { %v1779_v36 = vpop.f32.mrf.mxu1 }
 0x8ed   :  { %1931 = vtanh.f32 %v490_v34  ;;  %v491_v40 = vmul.f32 0.5, %v490_v34 }
 0x8ee   :  { %v487_v37 = vpop.f32.mrf.mxu1 }
 0x8ef   :  { %1933 = vtanh.f32 %v491_v40 }
 0x8f0   :  { %v1780_v38 = vpop.f32.mrf.mxu1 }
 0x8fa   :  { %v1932_v39 = vpop.eup %1931 }
 0x8fb   :  { %498 = vrot.lane.b32.xlu1 %v1932_v39, %s2034_s23 }
 0x8fc   :  { %v1934_v41 = vpop.eup %1933 }
 0x8fd   :  { %v493_v42 = vmul.f32 0.5, %v1934_v41 }
 0x8ff   :  { %v494_v43 = vadd.f32 0.5, %v493_v42 }
 0x901   :  { %v496_v46 = vmul.f32 %v494_v43, %v431_v35 }
 0x96d   :  { %v499_v44 = vpop.permute.xlu1 %498 }
 0x96e   :  { %v501_v45 = vmul.f32 %v499_v44, %v494_v43 }
 0x970   :  { %503 = vrot.lane.b32.xlu0 %v501_v45, %s2035_s1 }
 0x9e2   :  { %v504_v47 = vpop.permute.xlu0 %503 }
 0x9e3   :  { %v506_v48 = vadd.f32 %v504_v47, %v496_v46  ;;  %v176_v46 = vadd.f32 %v2194_v62, %v2140_v11  ;;  %v433_v62 = vsel %vm43_vm4, %v2209_v26, 0.0 }
 0x9e5   :  { %1935 = vtanh.f32 %v506_v48  ;;  %v513_v63 = vsel %vm44_vm5, %v506_v48, %v431_v35 }
 0x9f2   :  { %v1936_v49 = vpop.eup %1935 }
 0x9f3   :  { %509 = vrot.lane.b32.xlu1 %v1936_v49, %s2034_s23 }
 0xa65   :  { %v510_v50 = vpop.permute.xlu1 %509 }
 0xa66   :  { %v2230_v51 = vmul.f32 %v510_v50, %v494_v43 }
 0xa68   :  { %v514_v52 = vsel %vm44_vm5, %v2230_v51, %v432_v27 }
 0xa69   :  { %v525_v53 = vpack.c.bf16 %v514_v52, %v514_v52 }
 0xa6b   :  { %527 = vrot.lane.b32.xlu0 %v525_v53, %s2035_s1 }
 0xadd   :  { %v528_v54 = vpop.permute.xlu0 %527 }
 0xade   :  { %1786 = vmatmul.mubr.msk.bf16.vlgmr.msra.gmra.mxu0 %vm2588_vm1, %v528_v54 }
 0xadf   :  { %1798 = vmatpush3.bf16.msra.mxu0 %v2094_v2  ;;  %1801 = vmatprep.mubr.msk.bf16.mxu0 %vm2032_vm0, %v2031_v1 }
 0xae0   :  { %1799 = vmatprep.subr.bf16.mxu0 %v2031_v1 }
 0xae3   :  { %1800 = vmatpush3.bf16.msra.mxu0 %v2105_v4 }
 0xb9e   :  { %v566_v56 = vpop.f32.mrf.mxu0 }
 0xb9f   :  { %v572_v57 = vadd.f32 %v566_v56, %v168_v55 }
 0xba0   :  { %v1787_v59 = vpop.f32.mrf.mxu0 }
 0xba1   :  { %1937 = vtanh.f32 %v572_v57  ;;  %v573_v6 = vmul.f32 0.5, %v572_v57 }
 0xba2   :  { %v569_v60 = vpop.f32.mrf.mxu0 }
 0xba3   :  { %1939 = vtanh.f32 %v573_v6 }
 0xba4   :  { %v1788_v61 = vpop.f32.mrf.mxu0 }
 0xba5   :  { %v1671_v61 = vpack.c.bf16 %v433_v62, %v433_v62 }
 0xbae   :  { %v1938_v5 = vpop.eup %1937 }
 0xbaf   :  { %580 = vrot.lane.b32.xlu1 %v1938_v5, %s2034_s23 }
 0xbb0   :  { %v1940_v8 = vpop.eup %1939 }
 0xbb1   :  { %v575_v9 = vmul.f32 0.5, %v1940_v8 }
 0xbb3   :  { %v576_v12 = vadd.f32 0.5, %v575_v9 }
 0xbb5   :  { %v578_v15 = vmul.f32 %v576_v12, %v513_v63 }
 0xc21   :  { %v581_v13 = vpop.permute.xlu1 %580 }
 0xc22   :  { %v583_v14 = vmul.f32 %v581_v13, %v576_v12  ;;  %v1906_v13 = vld [vmem:[%s2584_s6] sm:$0xff]  }
 0xc24   :  { %585 = vrot.lane.b32.xlu0 %v583_v14, %s2035_s1 }
 0xc96   :  { %v586_v16 = vpop.permute.xlu0 %585 }
 0xc97   :  { %v588_v17 = vadd.f32 %v586_v16, %v578_v15  ;;  %v515_v16 = vsel %vm44_vm5, %v2230_v51, 0.0 }
 0xc99   :  { %1941 = vtanh.f32 %v588_v17  ;;  %v595_v3 = vsel %vm45_vm6, %v588_v17, %v513_v63  ;;  %v351_v63 = vsel %vm42_vm3, %v2180_v58, 0.0  ;;  %v1672_v17 = vpack.c.bf16 %v515_v16, %v515_v16 }
 0xc9a   :  { %v1670_v15 = vpack.c.bf16 %v351_v63, %v351_v63 }
 0xca6   :  { %v1942_v18 = vpop.eup %1941 }
 0xca7   :  { %591 = vrot.lane.b32.xlu1 %v1942_v18, %s2034_s23 }
 0xd19   :  { %v592_v19 = vpop.permute.xlu1 %591 }
 0xd1a   :  { %v2250_v20 = vmul.f32 %v592_v19, %v576_v12 }
 0xd1c   :  { %v596_v10 = vsel %vm45_vm6, %v2250_v20, %v514_v52 }
 0xd1d   :  { %v607_v21 = vpack.c.bf16 %v596_v10, %v596_v10 }
 0xd1f   :  { %609 = vrot.lane.b32.xlu0 %v607_v21, %s2035_s1 }
 0xd91   :  { %v610_v22 = vpop.permute.xlu0 %609 }
 0xd92   :  { %1794 = vmatmul.mubr.msk.bf16.vlgmr.msra.gmra.mxu1 %vm2588_vm1, %v610_v22 }
 0xd93   :  { %1806 = vmatpush3.bf16.msra.mxu1 %v2094_v2  ;;  %1809 = vmatprep.mubr.msk.bf16.mxu1 %vm2032_vm0, %v2031_v1 }
 0xd94   :  { %1807 = vmatprep.subr.bf16.mxu1 %v2031_v1 }
 0xd97   :  { %1808 = vmatpush3.bf16.msra.mxu1 %v2105_v4 }
 0xd98   :  { %1825 = vmatprep.subr.bf16.mxu1 %v2031_v1 }
 0xe52   :  { %v648_v24 = vpop.f32.mrf.mxu1 }
 0xe53   :  { %v654_v25 = vadd.f32 %v648_v24, %v171_v23  ;;  %v2328_v24 = vld [vmem:[%s2585_s7 + $0x8] sm:$0xff]  }
 0xe54   :  { %v1795_v27 = vpop.f32.mrf.mxu1 }
 0xe55   :  { %1943 = vtanh.f32 %v654_v25  ;;  %v655_v2 = vmul.f32 0.5, %v654_v25  ;;  %v2336_v25 = vld [vmem:[%s2585_s7] sm:$0xff]  }
 0xe56   :  { %v651_v28 = vpop.f32.mrf.mxu1 }
 0xe57   :  { %1945 = vtanh.f32 %v655_v2  ;;  %v179_v28 = vadd.f32 %v2198_v0, %v2140_v11 }
 0xe58   :  { %v1796_v30 = vpop.f32.mrf.mxu1 }
 0xe62   :  { %v1944_v31 = vpop.eup %1943 }
 0xe63   :  { %662 = vrot.lane.b32.xlu1 %v1944_v31, %s2034_s23 }
 0xe64   :  { %v1946_v32 = vpop.eup %1945 }
 0xe65   :  { %v657_v34 = vmul.f32 0.5, %v1946_v32 }
 0xe67   :  { %v658_v36 = vadd.f32 0.5, %v657_v34 }
 0xe69   :  { %v660_v38 = vmul.f32 %v658_v36, %v595_v3 }
 0xed5   :  { %v663_v4 = vpop.permute.xlu1 %662 }
 0xed6   :  { %v665_v37 = vmul.f32 %v663_v4, %v658_v36 }
 0xed8   :  { %667 = vrot.lane.b32.xlu0 %v665_v37, %s2035_s1 }
 0xf4a   :  { %v668_v39 = vpop.permute.xlu0 %667 }
 0xf4b   :  { %v670_v40 = vadd.f32 %v668_v39, %v660_v38 }
 0xf4d   :  { %1947 = vtanh.f32 %v670_v40  ;;  %v2291_v5 = vsel %vm2591_vm7, %v670_v40, %v595_v3 }
 0xf5a   :  { %v1948_v41 = vpop.eup %1947 }
 0xf5b   :  { %673 = vrot.lane.b32.xlu1 %v1948_v41, %s2034_s23 }
 0xfcd   :  { %v674_v42 = vpop.permute.xlu1 %673 }
 0xfce   :  { %v2271_v43 = vmul.f32 %v674_v42, %v658_v36  ;;  %v2361_v36 = vld [vmem:[%s2586_s8] ss:$0 sm:$0xff] }
 0xfd0   :  { %v678_v44 = vsel %vm2591_vm7, %v2271_v43, %v596_v10 }
 0xfd1   :  { %v689_v45 = vpack.c.bf16 %v678_v44, %v678_v44 }
 0xfd3   :  { %691 = vrot.lane.b32.xlu0 %v689_v45, %s2035_s1 }
0x1045   :  { %v692_v35 = vpop.permute.xlu0 %691 }
0x1046   :  { %1802 = vmatmul.mubr.msk.bf16.vlgmr.msra.gmra.mxu0 %vm2588_vm1, %v692_v35 }
0x1106   :  { %v730_v47 = vpop.f32.mrf.mxu0 }
0x1107   :  { %v736_v48 = vadd.f32 %v730_v47, %v176_v46 }
0x1108   :  { %v1803_v49 = vpop.f32.mrf.mxu0 }
0x1109   :  { %1949 = vtanh.f32 %v736_v48  ;;  %v737_v54 = vmul.f32 0.5, %v736_v48 }
0x110a   :  { %v733_v50 = vpop.f32.mrf.mxu0 }
0x110b   :  { %1951 = vtanh.f32 %v737_v54 }
0x110c   :  { %v1804_v52 = vpop.f32.mrf.mxu0 }
0x1116   :  { %v1950_v53 = vpop.eup %1949 }
0x1117   :  { %744 = vrot.lane.b32.xlu1 %v1950_v53, %s2034_s23 }
0x1118   :  { %v1952_v55 = vpop.eup %1951 }
0x1119   :  { %v739_v56 = vmul.f32 0.5, %v1952_v55 }
0x111b   :  { %v740_v57 = vadd.f32 0.5, %v739_v56 }
0x111d   :  { %v742_v6 = vmul.f32 %v740_v57, %v2291_v5 }
0x1189   :  { %v745_v59 = vpop.permute.xlu1 %744 }
0x118a   :  { %v747_v60 = vmul.f32 %v745_v59, %v740_v57 }
0x118c   :  { %749 = vrot.lane.b32.xlu0 %v747_v60, %s2035_s1 }
0x1190   :  { %275 = vrot.lane.b32.xlu0 %v2151_v33, %s2035_s1  ;;  %v1905_v33 = vld [vmem:[%s2584_s6 + $0x8] sm:$0xff]  }
0x1191   :  { %1813 = vmatprep.subr.bf16.mxu0 %v1905_v33 }
0x1192   :  { %1814 = vmatpush3.bf16.msra.mxu0 %v1905_v33 }
0x1193   :  { %1815 = vmatprep.subr.bf16.mxu0 %v1906_v13 }
0x1194   :  { %438 = vrot.lane.b32.xlu0 %v1671_v61, %s2035_s1 }
0x1196   :  { %1816 = vmatpush3.bf16.msra.mxu0 %v1906_v13 }
0x1197   :  { %1841 = vmatprep.subr.bf16.mxu0 %v2031_v1 }
0x11fe   :  { %v750_v8 = vpop.permute.xlu0 %749 }
0x11ff   :  { %v2294_v9 = vadd.f32 %v750_v8, %v742_v6 }
0x1201   :  { %1953 = vtanh.f32 %v2294_v9  ;;  %v759_v8 = vsel %vm2590_vm9, %v2294_v9, %v2291_v5  ;;  %v597_v5 = vsel %vm45_vm6, %v2250_v20, 0.0 }
0x1202   :  { %v276_v12 = vpop.permute.xlu0 %275  ;;  %v1673_v9 = vpack.c.bf16 %v597_v5, %v597_v5 }
0x1203   :  { %279 = vst.msk [vmem:[#allocation2] sm:$0xf] %vm278_vm8, %v276_v12 }
0x1206   :  { %v439_v26 = vpop.permute.xlu0 %438 }
0x1207   :  { %441 = vst.msk [vmem:[#allocation2 + $0x8] sm:$0xf] %vm278_vm8, %v439_v26 }
0x120e   :  { %v1954_v14 = vpop.eup %1953 }
0x120f   :  { %755 = vrot.lane.b32.xlu1 %v1954_v14, %s2034_s23 }
0x1213   :  { %356 = vrot.lane.b32.xlu1 %v1670_v15, %s2035_s1 }
0x1217   :  { %520 = vrot.lane.b32.xlu1 %v1672_v17, %s2035_s1 }
0x1281   :  { %v756_v18 = vpop.permute.xlu1 %755 }
0x1282   :  { %v2315_v19 = vmul.f32 %v756_v18, %v740_v57 }
0x1284   :  { %v760_v58 = vsel %vm2590_vm9, %v2315_v19, %v678_v44  ;;  %v761_v63 = vsel %vm2590_vm9, %v2315_v19, 0.0 }
0x1285   :  { %v357_v10 = vpop.permute.xlu1 %356  ;;  %v771_v21 = vpack.c.bf16 %v760_v58, %v760_v58  ;;  %v1675_v15 = vpack.c.bf16 %v761_v63, %v761_v63 }
0x1286   :  { %359 = vst.msk [vmem:[#allocation2 + $0x4] sm:$0xf] %vm278_vm8, %v357_v10 }
0x1287   :  { %773 = vrot.lane.b32.xlu0 %v771_v21, %s2035_s1 }
0x1289   :  { %v521_v51 = vpop.permute.xlu1 %520 }
0x128a   :  { %523 = vst.msk [vmem:[#allocation2 + $0xc] sm:$0xf] %vm278_vm8, %v521_v51 }
0x128d   :  { %v1907_v22 = vld [vmem:[#allocation2] sm:$0xff]  }
0x128e   :  { %1817 = vmatprep.mubr.msk.bf16.mxu0 %vm2588_vm1, %v1907_v22 }
0x1291   :  { %v1908_v23 = vld [vmem:[#allocation2 + $0x8] sm:$0xff]  }
0x1292   :  { %1818 = vmatmul.mubr.msk.bf16.vlgmr.msra.gmra.mxu0 %vm2588_vm1, %v1908_v23 }
0x1293   :  { %1842 = vmatpush3.bf16.msra.mxu0 %v2328_v24 }
0x1294   :  { %1843 = vmatprep.subr.bf16.mxu0 %v2031_v1 }
0x1297   :  { %1844 = vmatpush3.bf16.msra.mxu0 %v2336_v25 }
0x1298   :  { %1857 = vmatprep.subr.bf16.mxu0 %v2031_v1 }
0x12f9   :  { %v774_v27 = vpop.permute.xlu0 %773 }
0x12fa   :  { %1810 = vmatmul.mubr.msk.bf16.vlgmr.msra.gmra.mxu1 %vm2588_vm1, %v774_v27 }
0x12fb   :  { %1826 = vmatpush3.bf16.msra.mxu1 %v2328_v24  ;;  %1829 = vmatprep.mubr.msk.bf16.mxu1 %vm2032_vm0, %v2031_v1 }
0x12fc   :  { %1827 = vmatprep.subr.bf16.mxu1 %v2031_v1 }
0x12ff   :  { %1828 = vmatpush3.bf16.msra.mxu1 %v2336_v25 }
0x1300   :  { %1833 = vmatprep.subr.bf16.mxu1 %v2031_v1 }
0x1302   :  { %1830 = vmatmul.mubr.bf16.vlgmr.msra.gmra.mxu1 %v2033_v7 }
0x1303   :  { %1834 = vmatpush3.bf16.msra.mxu1 %v2328_v24  ;;  %1837 = vmatprep.mubr.msk.bf16.mxu1 %vm2032_vm0, %v2031_v1 }
0x1304   :  { %1835 = vmatprep.subr.bf16.mxu1 %v2031_v1 }
0x1307   :  { %1836 = vmatpush3.bf16.msra.mxu1 %v2336_v25 }
0x1308   :  { %1849 = vmatprep.subr.bf16.mxu1 %v2031_v1 }
0x1352   :  { %v2356_v30 = vpop.f32.mrf.mxu0 }
0x1354   :  { %v951_v7 = vpop.f32.mrf.mxu0 }
0x1355   :  { %v952_v37 = vadd.f32 %v2361_v36, %v951_v7 }
0x1356   :  { %v2401_v20 = vpop.f32.mrf.mxu0 }
0x1358   :  { %v954_v58 = vpop.f32.mrf.mxu0 }
0x1359   :  { %v955_v10 = vadd.f32 %v2361_v36, %v954_v58 }
0x13ba   :  { %v812_v31 = vpop.f32.mrf.mxu1 }
0x13bb   :  { %v818_v2 = vadd.f32 %v812_v31, %v179_v28 }
0x13bc   :  { %v1811_v32 = vpop.f32.mrf.mxu1 }
0x13bd   :  { %v819_v53 = vmul.f32 0.5, %v818_v2 }
0x13be   :  { %v815_v34 = vpop.f32.mrf.mxu1 }
0x13c0   :  { %v1812_v4 = vpop.f32.mrf.mxu1 }
0x13c2   :  { %v1037_v3 = vpop.f32.mrf.mxu1 }
0x13c3   :  { %v1043_v38 = vadd.f32 %v1037_v3, %v952_v37 }
0x13c4   :  { %v1831_v39 = vpop.f32.mrf.mxu1 }
0x13c5   :  { %1955 = vtanh.f32 %v1043_v38  ;;  %v1044_v41 = vmul.f32 0.5, %v1043_v38 }
0x13c6   :  { %v1040_v11 = vpop.f32.mrf.mxu1 }
0x13c7   :  { %1957 = vtanh.f32 %v1044_v41  ;;  %v679_v11 = vsel %vm2591_vm7, %v2271_v43, 0.0 }
0x13c8   :  { %v1832_v0 = vpop.f32.mrf.mxu1 }
0x13d2   :  { %v1956_v40 = vpop.eup %1955 }
0x13d3   :  { %1051 = vrot.lane.b32.xlu1 %v1956_v40, %s2034_s23  ;;  %v1674_v40 = vpack.c.bf16 %v679_v11, %v679_v11 }
0x13d4   :  { %v1958_v42 = vpop.eup %1957 }
0x13d5   :  { %v1046_v44 = vmul.f32 0.5, %v1958_v42 }
0x13d7   :  { %v1047_v45 = vadd.f32 0.5, %v1046_v44 }
0x13d9   :  { %v1049_v47 = vmul.f32 0.0, %v1047_v45 }
0x1445   :  { %v1052_v35 = vpop.permute.xlu1 %1051 }
0x1446   :  { %v1054_v46 = vmul.f32 %v1052_v35, %v1047_v45 }
0x1448   :  { %1056 = vrot.lane.b32.xlu0 %v1054_v46, %s2035_s1 }
0x14ba   :  { %v1057_v48 = vpop.permute.xlu0 %1056 }
0x14bb   :  { %v2366_v49 = vadd.f32 %v1057_v48, %v1049_v47 }
0x14bd   :  { %1959 = vtanh.f32 %v2366_v49  ;;  %v1066_v4 = vsel %vm41_vm2, %v2366_v49, 0.0 }
0x14be   :  { %1961 = vtanh.f32 %v818_v2 }
0x14bf   :  { %1963 = vtanh.f32 %v819_v53 }
0x14ca   :  { %v1960_v50 = vpop.eup %1959 }
0x14cb   :  { %1062 = vrot.lane.b32.xlu1 %v1960_v50, %s2034_s23  ;;  %v1962_v52 = vpop.eup %1961 }
0x14cc   :  { %v1964_v54 = vpop.eup %1963 }
0x14cd   :  { %v821_v55 = vmul.f32 0.5, %v1964_v54 }
0x14cf   :  { %826 = vrot.lane.b32.xlu1 %v1962_v52, %s2034_s23  ;;  %v822_v60 = vadd.f32 0.5, %v821_v55 }
0x14d1   :  { %v824_v26 = vmul.f32 %v822_v60, %v759_v8 }
0x153d   :  { %v1063_v56 = vpop.permute.xlu1 %1062 }
0x153e   :  { %v1065_v57 = vmul.f32 %v1063_v56, %v1047_v45  ;;  %v960_v56 = vadd.f32 %v2356_v30, %v2361_v36 }
0x1540   :  { %v2373_v59 = vsel %vm41_vm2, %v1065_v57, 0.0 }
0x1541   :  { %v827_v62 = vpop.permute.xlu1 %826  ;;  %v1072_v61 = vpack.c.bf16 %v2373_v59, %v2373_v59 }
0x1542   :  { %v829_v6 = vmul.f32 %v827_v62, %v822_v60 }
0x1543   :  { %1074 = vrot.lane.b32.xlu0 %v1072_v61, %s2035_s1 }
0x1544   :  { %831 = vrot.lane.b32.xlu1 %v829_v6, %s2035_s1 }
0x15b5   :  { %v1075_v12 = vpop.permute.xlu0 %1074 }
0x15b6   :  { %1838 = vmatmul.mubr.msk.bf16.vlgmr.msra.gmra.mxu1 %vm2588_vm1, %v1075_v12  ;;  %v832_v33 = vpop.permute.xlu1 %831 }
0x15b7   :  { %v834_v13 = vadd.f32 %v832_v33, %v824_v26  ;;  %1850 = vmatpush3.bf16.msra.mxu1 %v2328_v24  ;;  %1853 = vmatprep.mubr.msk.bf16.mxu1 %vm2032_vm0, %v2031_v1 }
0x15b8   :  { %1851 = vmatprep.subr.bf16.mxu1 %v2031_v1 }
0x15b9   :  { %1965 = vtanh.f32 %v834_v13 }
0x15bb   :  { %1852 = vmatpush3.bf16.msra.mxu1 %v2336_v25 }
0x15bc   :  { %1865 = vmatprep.subr.bf16.mxu1 %v2031_v1 }
0x15c6   :  { %v1966_v14 = vpop.eup %1965 }
0x15c7   :  { %837 = vrot.lane.b32.xlu1 %v1966_v14, %s2034_s23 }
0x15cb   :  { %602 = vrot.lane.b32.xlu1 %v1673_v9, %s2035_s1 }
0x15cf   :  { %766 = vrot.lane.b32.xlu1 %v1675_v15, %s2035_s1 }
0x1639   :  { %v838_v16 = vpop.permute.xlu1 %837 }
0x163a   :  { %v840_v0 = vmul.f32 %v838_v16, %v822_v60 }
0x163c   :  { %v841_v41 = vsel %vm2589_vm10, %v840_v0, 0.0 }
0x163d   :  { %v603_v17 = vpop.permute.xlu1 %602  ;;  %v1676_v42 = vpack.c.bf16 %v841_v41, %v841_v41 }
0x163e   :  { %605 = vst.msk [vmem:[#allocation2 + $0x10] sm:$0xf] %vm278_vm8, %v603_v17 }
0x1641   :  { %v767_v18 = vpop.permute.xlu1 %766 }
0x1642   :  { %769 = vst.msk [vmem:[#allocation2 + $0x18] sm:$0xf] %vm278_vm8, %v767_v18 }
0x1676   :  { %v1113_v21 = vpop.f32.mrf.mxu1 }
0x1677   :  { %v1119_v51 = vadd.f32 %v1113_v21, %v955_v10 }
0x1678   :  { %v1839_v19 = vpop.f32.mrf.mxu1 }
0x1679   :  { %1967 = vtanh.f32 %v1119_v51  ;;  %v1120_v28 = vmul.f32 0.5, %v1119_v51  ;;  %v963_v51 = vadd.f32 %v2401_v20, %v2361_v36 }
0x167a   :  { %v1116_v22 = vpop.f32.mrf.mxu1 }
0x167b   :  { %1969 = vtanh.f32 %v1120_v28 }
0x167c   :  { %v1840_v23 = vpop.f32.mrf.mxu1 }
0x1686   :  { %v1968_v27 = vpop.eup %1967 }
0x1687   :  { %1127 = vrot.lane.b32.xlu0 %v1968_v27, %s2034_s23 }
0x1688   :  { %v1970_v31 = vpop.eup %1969 }
0x1689   :  { %v1122_v2 = vmul.f32 0.5, %v1970_v31 }
0x168b   :  { %v1123_v32 = vadd.f32 0.5, %v1122_v2 }
0x168d   :  { %v1125_v37 = vmul.f32 %v1123_v32, %v1066_v4 }
0x16f9   :  { %v1128_v7 = vpop.permute.xlu0 %1127 }
0x16fa   :  { %v1130_v34 = vmul.f32 %v1128_v7, %v1123_v32 }
0x16fc   :  { %1132 = vrot.lane.b32.xlu0 %v1130_v34, %s2035_s1 }
0x176e   :  { %v1133_v3 = vpop.permute.xlu0 %1132 }
0x176f   :  { %v1135_v38 = vadd.f32 %v1133_v3, %v1125_v37 }
0x1771   :  { %1971 = vtanh.f32 %v1135_v38  ;;  %v1142_v30 = vsel %vm42_vm3, %v1135_v38, %v1066_v4 }
0x177e   :  { %v1972_v39 = vpop.eup %1971 }
0x177f   :  { %1138 = vrot.lane.b32.xlu0 %v1972_v39, %s2034_s23 }
0x1783   :  { %684 = vrot.lane.b32.xlu0 %v1674_v40, %s2035_s1 }
0x1787   :  { %846 = vrot.lane.b32.xlu0 %v1676_v42, %s2035_s1 }
0x17f1   :  { %v1139_v44 = vpop.permute.xlu0 %1138 }
0x17f2   :  { %v1141_v45 = vmul.f32 %v1139_v44, %v1123_v32 }
0x17f4   :  { %v2421_v43 = vsel %vm42_vm3, %v1141_v45, %v2373_v59 }
0x17f5   :  { %v685_v35 = vpop.permute.xlu0 %684  ;;  %v1148_v46 = vpack.c.bf16 %v2421_v43, %v2421_v43 }
0x17f6   :  { %687 = vst.msk [vmem:[#allocation2 + $0x14] sm:$0xf] %vm278_vm8, %v685_v35 }
0x17f7   :  { %1150 = vrot.lane.b32.xlu1 %v1148_v46, %s2035_s1 }
0x17f9   :  { %v847_v47 = vpop.permute.xlu0 %846 }
0x17fa   :  { %849 = vst.msk [vmem:[#allocation2 + $0x1c] sm:$0xf] %vm278_vm8, %v847_v47 }
0x17fd   :  { %v1911_v48 = vld [vmem:[#allocation2 + $0x10] sm:$0xff]  }
0x17fe   :  { %1821 = vmatprep.mubr.msk.bf16.mxu0 %vm2588_vm1, %v1911_v48 }
0x1801   :  { %v1912_v49 = vld [vmem:[#allocation2 + $0x18] sm:$0xff]  }
0x1802   :  { %1822 = vmatmul.mubr.msk.bf16.gmra.mxu0 %vm2588_vm1, %v1912_v49 }
0x1803   :  { %1845 = vmatprep.mubr.msk.bf16.mxu0 %vm2032_vm0, %v2031_v1 }
0x1869   :  { %v1151_v50 = vpop.permute.xlu1 %1150 }
0x186a   :  { %1846 = vmatmul.mubr.msk.bf16.vlgmr.msra.gmra.mxu0 %vm2588_vm1, %v1151_v50 }
0x186b   :  { %1858 = vmatpush3.bf16.msra.mxu0 %v2328_v24  ;;  %1861 = vmatprep.mubr.msk.bf16.mxu0 %vm2032_vm0, %v2031_v1 }
0x186c   :  { %1859 = vmatprep.subr.bf16.mxu0 %v2031_v1 }
0x186f   :  { %1860 = vmatpush3.bf16.msra.mxu0 %v2336_v25 }
0x1870   :  { %1873 = vmatprep.subr.bf16.mxu0 %v2031_v1 }
0x18c2   :  { %v2439_v52 = vpop.f32.mrf.mxu0 }
0x18c4   :  { %v2441_v53 = vpop.f32.mrf.mxu0 }
0x18c5   :  { %v968_v45 = vadd.f32 %v2361_v36, %v2441_v53 }
0x18c6   :  { %v2443_v54 = vpop.f32.mrf.mxu0 }
0x18c8   :  { %v2445_v55 = vpop.f32.mrf.mxu0 }
0x192a   :  { %v1189_v57 = vpop.f32.mrf.mxu0 }
0x192b   :  { %v1195_v60 = vadd.f32 %v1189_v57, %v960_v56 }
0x192c   :  { %v1847_v62 = vpop.f32.mrf.mxu0 }
0x192d   :  { %1973 = vtanh.f32 %v1195_v60  ;;  %v1196_v12 = vmul.f32 0.5, %v1195_v60 }
0x192e   :  { %v1192_v61 = vpop.f32.mrf.mxu0 }
0x192f   :  { %1975 = vtanh.f32 %v1196_v12 }
0x1930   :  { %v1848_v6 = vpop.f32.mrf.mxu0 }
0x193a   :  { %v1974_v8 = vpop.eup %1973 }
0x193b   :  { %1203 = vrot.lane.b32.xlu0 %v1974_v8, %s2034_s23 }
0x193c   :  { %v1976_v26 = vpop.eup %1975 }
0x193d   :  { %v1198_v33 = vmul.f32 0.5, %v1976_v26 }
0x193f   :  { %v1199_v13 = vadd.f32 0.5, %v1198_v33 }
0x1941   :  { %v1201_v9 = vmul.f32 %v1199_v13, %v1142_v30 }
0x19ad   :  { %v1204_v14 = vpop.permute.xlu0 %1203 }
0x19ae   :  { %v1206_v5 = vmul.f32 %v1204_v14, %v1199_v13 }
0x19b0   :  { %1208 = vrot.lane.b32.xlu1 %v1206_v5, %s2035_s1 }
0x1a22   :  { %v1209_v63 = vpop.permute.xlu1 %1208 }
0x1a23   :  { %v1211_v15 = vadd.f32 %v1209_v63, %v1201_v9  ;;  %v971_v63 = vadd.f32 %v2361_v36, %v2445_v55 }
0x1a25   :  { %1977 = vtanh.f32 %v1211_v15  ;;  %v1218_v20 = vsel %vm43_vm4, %v1211_v15, %v1142_v30 }
0x1a32   :  { %v1978_v16 = vpop.eup %1977 }
0x1a33   :  { %1214 = vrot.lane.b32.xlu0 %v1978_v16, %s2034_s23 }
0x1aa5   :  { %v1215_v17 = vpop.permute.xlu0 %1214 }
0x1aa6   :  { %v1217_v18 = vmul.f32 %v1215_v17, %v1199_v13 }
0x1aa8   :  { %v2457_v58 = vsel %vm43_vm4, %v1217_v18, %v2421_v43 }
0x1aa9   :  { %v1224_v10 = vpack.c.bf16 %v2457_v58, %v2457_v58 }
0x1aab   :  { %1226 = vrot.lane.b32.xlu1 %v1224_v10, %s2035_s1 }
0x1b1d   :  { %v1227_v21 = vpop.permute.xlu1 %1226 }
0x1b1e   :  { %1854 = vmatmul.mubr.msk.bf16.vlgmr.msra.gmra.mxu1 %vm2588_vm1, %v1227_v21 }
0x1b1f   :  { %1866 = vmatpush3.bf16.msra.mxu1 %v2328_v24  ;;  %1869 = vmatprep.mubr.msk.bf16.mxu1 %vm2032_vm0, %v2031_v1 }
0x1b20   :  { %1867 = vmatprep.subr.bf16.mxu1 %v2031_v1 }
0x1b23   :  { %1868 = vmatpush3.bf16.msra.mxu1 %v2336_v25 }
0x1b24   :  { %1881 = vmatprep.subr.bf16.mxu1 %v2031_v1 }
0x1bde   :  { %v1265_v19 = vpop.f32.mrf.mxu1 }
0x1bdf   :  { %v1271_v22 = vadd.f32 %v1265_v19, %v963_v51 }
0x1be0   :  { %v1855_v23 = vpop.f32.mrf.mxu1 }
0x1be1   :  { %1979 = vtanh.f32 %v1271_v22  ;;  %v1272_v2 = vmul.f32 0.5, %v1271_v22 }
0x1be2   :  { %v1268_v27 = vpop.f32.mrf.mxu1 }
0x1be3   :  { %1981 = vtanh.f32 %v1272_v2 }
0x1be4   :  { %v1856_v28 = vpop.f32.mrf.mxu1 }
0x1bee   :  { %v1980_v31 = vpop.eup %1979 }
0x1bef   :  { %1279 = vrot.lane.b32.xlu0 %v1980_v31, %s2034_s23 }
0x1bf0   :  { %v1982_v32 = vpop.eup %1981 }
0x1bf1   :  { %v1274_v7 = vmul.f32 0.5, %v1982_v32 }
0x1bf3   :  { %v1275_v34 = vadd.f32 0.5, %v1274_v7 }
0x1bf5   :  { %v1277_v3 = vmul.f32 %v1275_v34, %v1218_v20 }
0x1c61   :  { %v1280_v4 = vpop.permute.xlu0 %1279 }
0x1c62   :  { %v1282_v37 = vmul.f32 %v1280_v4, %v1275_v34 }
0x1c64   :  { %1284 = vrot.lane.b32.xlu1 %v1282_v37, %s2035_s1  ;;  %v976_v37 = vadd.f32 %v2439_v52, %v2361_v36 }
0x1cd6   :  { %v1285_v38 = vpop.permute.xlu1 %1284 }
0x1cd7   :  { %v1287_v39 = vadd.f32 %v1285_v38, %v1277_v3 }
0x1cd9   :  { %1983 = vtanh.f32 %v1287_v39  ;;  %v1294_v53 = vsel %vm44_vm5, %v1287_v39, %v1218_v20 }
0x1ce6   :  { %v1984_v11 = vpop.eup %1983 }
0x1ce7   :  { %1290 = vrot.lane.b32.xlu0 %v1984_v11, %s2034_s23 }
0x1d59   :  { %v1291_v0 = vpop.permute.xlu0 %1290 }
0x1d5a   :  { %v1293_v40 = vmul.f32 %v1291_v0, %v1275_v34 }
0x1d5c   :  { %v2479_v41 = vsel %vm44_vm5, %v1293_v40, %v2457_v58 }
0x1d5d   :  { %v1300_v42 = vpack.c.bf16 %v2479_v41, %v2479_v41 }
0x1d5f   :  { %1302 = vrot.lane.b32.xlu1 %v1300_v42, %s2035_s1 }
0x1dd1   :  { %v1303_v44 = vpop.permute.xlu1 %1302 }
0x1dd2   :  { %1862 = vmatmul.mubr.msk.bf16.vlgmr.msra.gmra.mxu0 %vm2588_vm1, %v1303_v44 }
0x1dd3   :  { %1874 = vmatpush3.bf16.msra.mxu0 %v2328_v24  ;;  %1877 = vmatprep.mubr.msk.bf16.mxu0 %vm2032_vm0, %v2031_v1 }
0x1dd4   :  { %1875 = vmatprep.subr.bf16.mxu0 %v2031_v1 }
0x1dd7   :  { %1876 = vmatpush3.bf16.msra.mxu0 %v2336_v25 }
0x1e92   :  { %v1341_v35 = vpop.f32.mrf.mxu0 }
0x1e93   :  { %v1347_v46 = vadd.f32 %v1341_v35, %v968_v45 }
0x1e94   :  { %v1863_v47 = vpop.f32.mrf.mxu0 }
0x1e95   :  { %1985 = vtanh.f32 %v1347_v46  ;;  %v1348_v56 = vmul.f32 0.5, %v1347_v46 }
0x1e96   :  { %v1344_v48 = vpop.f32.mrf.mxu0 }
0x1e97   :  { %1987 = vtanh.f32 %v1348_v56 }
0x1e98   :  { %v1864_v49 = vpop.f32.mrf.mxu0 }
0x1ea2   :  { %v1986_v50 = vpop.eup %1985 }
0x1ea3   :  { %1355 = vrot.lane.b32.xlu0 %v1986_v50, %s2034_s23 }
0x1ea4   :  { %v1988_v57 = vpop.eup %1987 }
0x1ea5   :  { %v1350_v60 = vmul.f32 0.5, %v1988_v57 }
0x1ea7   :  { %v1351_v62 = vadd.f32 0.5, %v1350_v60 }
0x1ea9   :  { %v1353_v8 = vmul.f32 %v1351_v62, %v1294_v53 }
0x1f15   :  { %v1356_v61 = vpop.permute.xlu0 %1355 }
0x1f16   :  { %v1358_v6 = vmul.f32 %v1356_v61, %v1351_v62 }
0x1f18   :  { %1360 = vrot.lane.b32.xlu1 %v1358_v6, %s2035_s1  ;;  %v979_v6 = vadd.f32 %v2443_v54, %v2361_v36 }
0x1f8a   :  { %v1361_v12 = vpop.permute.xlu1 %1360 }
0x1f8b   :  { %v1363_v26 = vadd.f32 %v1361_v12, %v1353_v8 }
0x1f8d   :  { %1989 = vtanh.f32 %v1363_v26 }
0x1f9a   :  { %v1990_v33 = vpop.eup %1989 }
0x1f9b   :  { %1366 = vrot.lane.b32.xlu0 %v1990_v33, %s2034_s23 }
0x200d   :  { %v1367_v13 = vpop.permute.xlu0 %1366 }
0x200e   :  { %v1369_v14 = vmul.f32 %v1367_v13, %v1351_v62 }
0x2010   :  { %v2500_v5 = vsel %vm45_vm6, %v1369_v14, %v2479_v41 }
0x2011   :  { %v1376_v30 = vpack.c.bf16 %v2500_v5, %v2500_v5 }
0x2013   :  { %1378 = vrot.lane.b32.xlu1 %v1376_v30, %s2035_s1 }
0x2085   :  { %v1379_v9 = vpop.permute.xlu1 %1378 }
0x2086   :  { %1870 = vmatmul.mubr.msk.bf16.vlgmr.msra.gmra.mxu1 %vm2588_vm1, %v1379_v9 }
0x2087   :  { %1882 = vmatpush3.bf16.msra.mxu1 %v2328_v24  ;;  %1885 = vmatprep.mubr.msk.bf16.mxu1 %vm2032_vm0, %v2031_v1 }
0x2088   :  { %1883 = vmatprep.subr.bf16.mxu1 %v2031_v1 }
0x208b   :  { %1884 = vmatpush3.bf16.msra.mxu1 %v2336_v25  ;;  %v1370_v25 = vsel %vm45_vm6, %v1363_v26, %v1294_v53 }
0x2146   :  { %v1417_v15 = vpop.f32.mrf.mxu1 }
0x2147   :  { %v1423_v16 = vadd.f32 %v1417_v15, %v971_v63 }
0x2148   :  { %v1871_v17 = vpop.f32.mrf.mxu1 }
0x2149   :  { %1991 = vtanh.f32 %v1423_v16  ;;  %v1424_v24 = vmul.f32 0.5, %v1423_v16 }
0x214a   :  { %v1420_v18 = vpop.f32.mrf.mxu1 }
0x214b   :  { %1993 = vtanh.f32 %v1424_v24 }
0x214c   :  { %v1872_v10 = vpop.f32.mrf.mxu1 }
0x2156   :  { %v1992_v21 = vpop.eup %1991 }
0x2157   :  { %1431 = vrot.lane.b32.xlu0 %v1992_v21, %s2034_s23  ;;  %v40_v21 = vstv %s2580_s2  ;;  %s2036_s2 = smov [#allocation5]  }
0x2158   :  { %v1994_v51 = vpop.eup %1993  ;;  %vm1068_vm11 = vcmp.eq.s32.totalorder %v40_v21, 0  ;;  %vm1144_vm12 = vcmp.eq.s32.totalorder %v40_v21, 1  ;;  %vm1220_vm13 = vcmp.eq.s32.totalorder %v40_v21, 2  ;;  %vm1296_vm15 = vcmp.eq.s32.totalorder %v40_v21, 3  ;;  %s1613_s14 = sshll.u32 %s2036_s2, 4  ;;  %s1614_s14 = int_to_ptr.vmem [resolvable:$true] %s1613_s14 }
0x2159   :  { %v1426_v19 = vmul.f32 0.5, %v1994_v51  ;;  %vm1069_vm14 = vmand %vm41_vm2, %vm1068_vm11  ;;  %vm1372_vm8 = vcmp.eq.s32.totalorder %v40_v21, 4  ;;  %vm1448_vm10 = vcmp.eq.s32.totalorder %v40_v21, 5  ;;  %vm2592_vm11 = vcmp.gt.s32.totalorder %v2146_v29, 5  ;;  %s2009_s15 = scalar_lea.vmem %s1614_s14, 128  ;;  %p2014_p1 = scmp.lt.s32.totalorder %s1614_s14, %s1614_s14 }
0x215a   :  { %v1070_v24 = vsel %vm1069_vm14, %v2373_v59, 0.0  ;;  %vm1145_vm0 = vmand %vm42_vm3, %vm1144_vm12  ;;  %vm1599_vm3 = vcmp.eq.s32.totalorder %v40_v21, 7  ;;  %p2010_p0 = scmp.ne.s32.totalorder %s1614_s14, %s2009_s15  ;;  %p2015_p2 = scmp.lt.s32.totalorder %s2009_s15, %s2009_s15 }
0x215b   :  { %v1427_v22 = vadd.f32 0.5, %v1426_v19  ;;  %v1146_v51 = vsel %vm1145_vm0, %v2421_v43, %v1070_v24  ;;  %vm1373_vm2 = vmand %vm45_vm6, %vm1372_vm8 }
0x215c   :  { %p2016_p3 = por %p2015_p2, %p2014_p1 }
0x215d   :  { %v1429_v55 = vmul.f32 %v1427_v22, %v1370_v25 }
0x215e   :  { %p2017_p4 = pnand %p2016_p3, %p2010_p0 }
0x21c9   :  { %v1432_v1 = vpop.permute.xlu0 %1431 }
0x21ca   :  { %v1434_v23 = vmul.f32 %v1432_v1, %v1427_v22 }
0x21cc   :  { %1436 = vrot.lane.b32.xlu1 %v1434_v23, %s2035_s1 }
0x223e   :  { %v1437_v27 = vpop.permute.xlu1 %1436 }
0x223f   :  { %v1439_v28 = vadd.f32 %v1437_v27, %v1429_v55 }
0x2241   :  { %1995 = vtanh.f32 %v1439_v28  ;;  %v1446_v52 = vsel %vm2591_vm7, %v1439_v28, %v1370_v25 }
0x224e   :  { %v1996_v31 = vpop.eup %1995 }
0x224f   :  { %1442 = vrot.lane.b32.xlu0 %v1996_v31, %s2034_s23 }
0x22c1   :  { %v1443_v2 = vpop.permute.xlu0 %1442 }
0x22c2   :  { %v1445_v32 = vmul.f32 %v1443_v2, %v1427_v22 }
0x22c4   :  { %v2521_v7 = vsel %vm2591_vm7, %v1445_v32, %v2500_v5  ;;  %vm1524_vm7 = vcmp.eq.s32.totalorder %v40_v21, 6 }
0x22c5   :  { %v1452_v34 = vpack.c.bf16 %v2521_v7, %v2521_v7 }
0x22c7   :  { %1454 = vrot.lane.b32.xlu1 %v1452_v34, %s2035_s1 }
0x2339   :  { %v1455_v4 = vpop.permute.xlu1 %1454 }
0x233a   :  { %1878 = vmatmul.mubr.msk.bf16.vlgmr.msra.gmra.mxu0 %vm2588_vm1, %v1455_v4 }
0x23fa   :  { %v1493_v20 = vpop.f32.mrf.mxu0 }
0x23fb   :  { %v1499_v3 = vadd.f32 %v1493_v20, %v976_v37 }
0x23fc   :  { %v1879_v38 = vpop.f32.mrf.mxu0 }
0x23fd   :  { %1997 = vtanh.f32 %v1499_v3  ;;  %v1500_v40 = vmul.f32 0.5, %v1499_v3 }
0x23fe   :  { %v1496_v39 = vpop.f32.mrf.mxu0 }
0x23ff   :  { %1999 = vtanh.f32 %v1500_v40 }
0x2400   :  { %v1880_v11 = vpop.f32.mrf.mxu0 }
0x240a   :  { %v1998_v0 = vpop.eup %1997 }
0x240b   :  { %1507 = vrot.lane.b32.xlu0 %v1998_v0, %s2034_s23 }
0x240c   :  { %v2000_v42 = vpop.eup %1999 }
0x240d   :  { %v1502_v44 = vmul.f32 0.5, %v2000_v42 }
0x240f   :  { %v1503_v45 = vadd.f32 0.5, %v1502_v44 }
0x2411   :  { %v1505_v47 = vmul.f32 %v1503_v45, %v1446_v52 }
0x247d   :  { %v1508_v35 = vpop.permute.xlu0 %1507 }
0x247e   :  { %v1510_v46 = vmul.f32 %v1508_v35, %v1503_v45 }
0x2480   :  { %1512 = vrot.lane.b32.xlu1 %v1510_v46, %s2035_s1 }
0x24f2   :  { %v1513_v48 = vpop.permute.xlu1 %1512 }
0x24f3   :  { %v1515_v49 = vadd.f32 %v1513_v48, %v1505_v47 }
0x24f5   :  { %2001 = vtanh.f32 %v1515_v49  ;;  %v1522_v36 = vsel %vm2590_vm9, %v1515_v49, %v1446_v52 }
0x2502   :  { %v2002_v50 = vpop.eup %2001 }
0x2503   :  { %1518 = vrot.lane.b32.xlu0 %v2002_v50, %s2034_s23 }
0x2575   :  { %v1519_v56 = vpop.permute.xlu0 %1518 }
0x2576   :  { %v1521_v57 = vmul.f32 %v1519_v56, %v1503_v45 }
0x2578   :  { %v1523_v60 = vsel %vm2590_vm9, %v1521_v57, %v2521_v7  ;;  %vm1297_vm9 = vmand %vm44_vm5, %vm1296_vm15  ;;  %vm2594_vm5 = vcmp.gt.s32.totalorder %v2146_v29, 7 }
0x2579   :  { %v1528_v62 = vpack.c.bf16 %v1523_v60, %v1523_v60 }
0x257b   :  { %1530 = vrot.lane.b32.xlu1 %v1528_v62, %s2035_s1 }
0x25ed   :  { %v1531_v61 = vpop.permute.xlu1 %1530 }
0x25ee   :  { %1886 = vmatmul.mubr.msk.bf16.vlgmr.msra.gmra.mxu1 %vm2588_vm1, %v1531_v61  ;;  %vm1221_vm1 = vmand %vm43_vm4, %vm1220_vm13 }
0x25ef   :  { %v1222_v19 = vsel %vm1221_vm1, %v2457_v58, %v1146_v51  ;;  %vm1449_vm4 = vmand %vm2592_vm11, %vm1448_vm10  ;;  %vm2593_vm1 = vcmp.gt.s32.totalorder %v2146_v29, 6  ;;  %vm2596_vm10 = vcmask 261120  }
0x25f0   :  { %v1298_v22 = vsel %vm1297_vm9, %v2479_v41, %v1222_v19  ;;  %vm1525_vm12 = vmand %vm2593_vm1, %vm1524_vm7 }
0x25f1   :  { %v1374_v1 = vsel %vm1373_vm2, %v2500_v5, %v1298_v22  ;;  %vm2595_vm9 = vmmov %vm2594_vm5 }
0x25f2   :  { %v1450_v23 = vsel %vm1449_vm4, %v2521_v7, %v1374_v1  ;;  %vm1600_vm6 = vmand %vm2595_vm9, %vm1599_vm3 }
0x25f3   :  { %v1526_v58 = vsel %vm1525_vm12, %v1523_v60, %v1450_v23 }
0x26ae   :  { %v1569_v53 = vpop.f32.mrf.mxu1 }
0x26af   :  { %v1575_v8 = vadd.f32 %v1569_v53, %v979_v6 }
0x26b0   :  { %v1887_v12 = vpop.f32.mrf.mxu1 }
0x26b1   :  { %2003 = vtanh.f32 %v1575_v8  ;;  %v1576_v14 = vmul.f32 0.5, %v1575_v8 }
0x26b2   :  { %v1572_v26 = vpop.f32.mrf.mxu1 }
0x26b3   :  { %2005 = vtanh.f32 %v1576_v14 }
0x26b4   :  { %v1888_v33 = vpop.f32.mrf.mxu1 }
0x26be   :  { %v2004_v13 = vpop.eup %2003 }
0x26bf   :  { %1583 = vrot.lane.b32.xlu0 %v2004_v13, %s2034_s23 }
0x26c0   :  { %v2006_v30 = vpop.eup %2005 }
0x26c1   :  { %v1578_v9 = vmul.f32 0.5, %v2006_v30 }
0x26c3   :  { %v1579_v63 = vadd.f32 0.5, %v1578_v9 }
0x26c5   :  { %v1581_v54 = vmul.f32 %v1579_v63, %v1522_v36 }
0x2731   :  { %v1584_v15 = vpop.permute.xlu0 %1583 }
0x2732   :  { %v1586_v16 = vmul.f32 %v1584_v15, %v1579_v63 }
0x2734   :  { %1588 = vrot.lane.b32.xlu1 %v1586_v16, %s2035_s1 }
0x27a6   :  { %v1589_v17 = vpop.permute.xlu1 %1588 }
0x27a7   :  { %v1591_v18 = vadd.f32 %v1589_v17, %v1581_v54 }
0x27a9   :  { %2007 = vtanh.f32 %v1591_v18 }
0x27b6   :  { %v2008_v10 = vpop.eup %2007 }
0x27b7   :  { %1594 = vrot.lane.b32.xlu0 %v2008_v10, %s2034_s23 }
0x2829   :  { %v1595_v59 = vpop.permute.xlu0 %1594 }
0x282a   :  { %v1597_v43 = vmul.f32 %v1595_v59, %v1579_v63 }
0x282c   :  { %v1598_v41 = vsel %vm2594_vm5, %v1597_v43, %v1523_v60 }
0x282d   :  { %v1601_v25 = vsel %vm1600_vm6, %v1598_v41, %v1526_v58 }
0x282e   :  { %1603 = vrot.lane.b32.xlu1 %v1601_v25, %s2035_s1 }
0x28a0   :  { %v1604_v5 = vpop.permute.xlu1 %1603 }
0x28a1   :  { %1606 = vst.msk [vmem:[#allocation5] sm:$0xff] %vm2596_vm10, %v1604_v5 }
0x28a2   :  { %2020 = shalt.err (!%p2017_p4)
}
0x28a3   :  { %1616 = dma.vmem_to_hbm [thread:$0]  %s1614_s14, 128, %s2587_s9, [#allocation6]  }
0x28a4   :  { %2029 = dma.done.wait [#allocation6], 128  }
0x28a5   :  { %2030 = vsyncadd [#allocation6], 4294967168 }
0x28a6   :  { %1620 = vsyncpa [#allocation6], 1 }

</bundles_post_ra>
